<compile_context>
chip_gen: v7x
topology: tpu7x:2x2x1
jax: 0.10.0
libtpu: 0.0.40
codegen_flags: <defaults>
</compile_context>

<pallas_src>
import functools
import math

import jax
import jax.numpy as jnp
from jax import lax
from jax.experimental import pallas as pl
from jax.experimental.pallas import tpu as pltpu


_MASK_VALUE = -1e30          # large finite negative (avoids inf-inf NaN in online softmax)


def _pick_block(n):
    """Largest MXU/pipeline-friendly block that divides n (falls back to full extent)."""
    for b in (512, 256, 128):
        if b <= n and n % b == 0:
            return b
    return n


def _vmem_limit_bytes():
    """Per-generation VMEM budget: ~half of physical, conservative if unknown."""
    cap = None
    try:
        cap = int(pltpu.get_tpu_info().vmem_capacity_bytes)
    except Exception:
        cap = None
    if cap is None or cap <= 64 * 1024 * 1024:   # v7x-class (64 MiB / TC) or unknown
        return 32 * 1024 * 1024
    return 64 * 1024 * 1024                      # v5e / v6e (128 MiB)


# --------------------------------------------------------------------------------------
# Kernel 1: QKV projection with a full-width (C, 3C) matmul, per (batch, T-block).
#   x_ref: (blk_t, C); w_ref: (C, 3C) [Q cols pre-scaled by 1/sqrt(D)]; b_ref: (1, 3C)
#   q/k/v_ref: (H, blk_t, D)
# --------------------------------------------------------------------------------------
def _qkv_proj_kernel(x_ref, w_ref, b_ref, q_ref, k_ref, v_ref,
                     *, n_head, head_dim, compute_dtype):
    x = x_ref[...].astype(compute_dtype)
    y = jnp.dot(x, w_ref[...], preferred_element_type=jnp.float32)   # (blk_t, 3C) fp32
    y = y + b_ref[...]                                                # bias in fp32
    c = n_head * head_dim
    for h in range(n_head):                        # static head split (lane slices)
        lo = h * head_dim
        hi = lo + head_dim
        q_ref[h] = y[:, 0 * c + lo:0 * c + hi].astype(q_ref.dtype)
        k_ref[h] = y[:, 1 * c + lo:1 * c + hi].astype(k_ref.dtype)
        v_ref[h] = y[:, 2 * c + lo:2 * c + hi].astype(v_ref.dtype)


# --------------------------------------------------------------------------------------
# Kernel 2: flash attention on a triangular (q-block, kv-block) grid.
#   grid = (B, H, n_tri); scalar-prefetched qi_tab/kv_tab map flat step -> (qi, kv).
#   q_ref/k_ref/v_ref: (blk, D); y_ref: (blk, D)
# --------------------------------------------------------------------------------------
def _flash_attn_kernel(qi_tab_ref, kv_tab_ref, q_ref, k_ref, v_ref, y_ref,
                       m_ref, l_ref, acc_ref, *, blk, compute_dtype):
    t = pl.program_id(2)
    qi = qi_tab_ref[t]
    kv = kv_tab_ref[t]

    # First KV block of this (b, h, q-block) run: reset online-softmax state.
    @pl.when(kv == 0)
    def _init():
        m_ref[...] = jnp.full(m_ref.shape, _MASK_VALUE, m_ref.dtype)
        l_ref[...] = jnp.zeros(l_ref.shape, l_ref.dtype)
        acc_ref[...] = jnp.zeros(acc_ref.shape, acc_ref.dtype)

    is_diag = kv == qi       # blk_q == blk_k, so the diagonal block is exactly kv == qi

    def update(masked):
        qb = q_ref[...].astype(compute_dtype)      # (blk, D), pre-scaled by 1/sqrt(D)
        kb = k_ref[...].astype(compute_dtype)      # (blk, D)
        s = lax.dot_general(qb, kb, (((1,), (1,)), ((), ())),
                            preferred_element_type=jnp.float32)       # (blk, blk) fp32
        if masked:
            # Diagonal block: q_start == k_start, so the causal mask is just col <= row.
            rows = lax.broadcasted_iota(jnp.int32, (blk, blk), 0)
            cols = lax.broadcasted_iota(jnp.int32, (blk, blk), 1)
            s = jnp.where(cols <= rows, s, _MASK_VALUE)
        m_prev = m_ref[...]
        m_new = jnp.maximum(m_prev, jnp.max(s, axis=-1, keepdims=True))
        alpha = jnp.exp(m_prev - m_new)
        # NOTE: on v6e/v7x this exp can be evaluated at bf16 if the EUP slot binds;
        # keep s / mask / row stats in fp32 regardless.
        p = jnp.exp(s - m_new)
        l_ref[...] = alpha * l_ref[...] + jnp.sum(p, axis=-1, keepdims=True)
        acc_ref[...] = alpha * acc_ref[...] + jnp.dot(
            p.astype(compute_dtype), v_ref[...].astype(compute_dtype),
            preferred_element_type=jnp.float32)
        m_ref[...] = m_new

    @pl.when(jnp.logical_not(is_diag))
    def _off_diagonal():
        update(masked=False)

    @pl.when(is_diag)
    def _diagonal_and_finalize():
        update(masked=True)
        # Last contributing KV block of the run: deferred normalization (EUP reciprocal).
        y_ref[...] = (acc_ref[...] * pl.reciprocal(l_ref[...], approx=True)
                      ).astype(y_ref.dtype)


# --------------------------------------------------------------------------------------
# Kernel 3: output projection, reduction over heads done in-register per (b, T-block).
#   y_ref: (H, blk_t, D); wp_ref: (C, C) resident; bp_ref: (1, C); o_ref: (blk_t, C)
# --------------------------------------------------------------------------------------
def _out_proj_kernel(y_ref, wp_ref, bp_ref, o_ref, *, n_head, head_dim):
    blk_t = y_ref.shape[1]
    acc = jnp.zeros((blk_t, wp_ref.shape[1]), jnp.float32)
    for h in range(n_head):                          # static sublane slices of W_proj
        acc = acc + jnp.dot(y_ref[h], wp_ref[h * head_dim:(h + 1) * head_dim, :],
                            preferred_element_type=jnp.float32)
    o_ref[...] = (acc + bp_ref[...]).astype(o_ref.dtype)


# --------------------------------------------------------------------------------------
# Wrapper
# --------------------------------------------------------------------------------------
@functools.partial(jax.jit, static_argnames=("n_head", "compute_dtype"))
def causal_attention(x, wqkv, bqkv, wproj, bproj, n_head, compute_dtype=jnp.bfloat16):
    B, T, C = x.shape
    H = n_head
    assert C % H == 0
    D = C // H
    scale = 1.0 / math.sqrt(D)
    vmem_limit = _vmem_limit_bytes()

    # One-time weight prep (outside the hot kernels): fold 1/sqrt(D) into the Q
    # projection; pre-cast large weights to the MXU compute dtype (halves weight DMA).
    wqkv_s = jnp.concatenate([wqkv[:, :C] * scale, wqkv[:, C:]], axis=1).astype(compute_dtype)
    bqkv_s = jnp.concatenate([bqkv[:, :C] * scale, bqkv[:, C:]], axis=1).astype(jnp.float32)
    wproj_c = wproj.astype(compute_dtype)
    bproj_f = bproj.astype(jnp.float32)

    blk_t = _pick_block(T)        # T tile for the projection kernels
    blk = _pick_block(T)          # attention q/k tile (blk_q == blk_k)
    n_t = T // blk_t
    n_q = T // blk

    # ------------------- kernel 1: QKV projection, grid (B, n_t) -------------------
    qkv_shape = jax.ShapeDtypeStruct((B, H, T, D), compute_dtype)
    q, k, v = pl.pallas_call(
        functools.partial(_qkv_proj_kernel, n_head=H, head_dim=D,
                          compute_dtype=compute_dtype),
        out_shape=(qkv_shape, qkv_shape, qkv_shape),
        grid_spec=pltpu.PrefetchScalarGridSpec(
            num_scalar_prefetch=0,
            grid=(B, n_t),
            in_specs=[
                pl.BlockSpec((None, blk_t, C), lambda b, tb: (b, tb, 0)),   # x
                pl.BlockSpec((C, 3 * C), lambda b, tb: (0, 0)),             # Wqkv (resident)
                pl.BlockSpec((1, 3 * C), lambda b, tb: (0, 0)),             # bqkv (resident)
            ],
            out_specs=(
                pl.BlockSpec((None, H, blk_t, D), lambda b, tb: (b, 0, tb, 0)),
                pl.BlockSpec((None, H, blk_t, D), lambda b, tb: (b, 0, tb, 0)),
                pl.BlockSpec((None, H, blk_t, D), lambda b, tb: (b, 0, tb, 0)),
            ),
        ),
        compiler_params=pltpu.CompilerParams(
            dimension_semantics=("parallel", "parallel"),
            vmem_limit_bytes=vmem_limit),
    )(x, wqkv_s, bqkv_s)

    # ------- kernel 2: flash attention on the triangular (qi, kv) grid -------
    qi_idx, kv_idx = [], []
    for qi in range(n_q):
        for kv in range(qi + 1):
            qi_idx.append(qi)
            kv_idx.append(kv)
    n_tri = len(qi_idx)
    qi_tab = jnp.asarray(qi_idx, dtype=jnp.int32)
    kv_tab = jnp.asarray(kv_idx, dtype=jnp.int32)

    y = pl.pallas_call(
        functools.partial(_flash_attn_kernel, blk=blk, compute_dtype=compute_dtype),
        out_shape=jax.ShapeDtypeStruct((B, H, T, D), compute_dtype),
        grid_spec=pltpu.PrefetchScalarGridSpec(
            num_scalar_prefetch=2,
            grid=(B, H, n_tri),
            in_specs=[
                pl.BlockSpec((None, None, blk, D),
                             lambda b, h, t, qt, kt: (b, h, qt[t], 0)),      # q
                pl.BlockSpec((None, None, blk, D),
                             lambda b, h, t, qt, kt: (b, h, kt[t], 0)),      # k
                pl.BlockSpec((None, None, blk, D),
                             lambda b, h, t, qt, kt: (b, h, kt[t], 0)),      # v
            ],
            out_specs=pl.BlockSpec((None, None, blk, D),
                                   lambda b, h, t, qt, kt: (b, h, qt[t], 0)),
            scratch_shapes=[
                pltpu.VMEM((blk, 1), jnp.float32),    # running max m
                pltpu.VMEM((blk, 1), jnp.float32),    # running denominator l
                pltpu.VMEM((blk, D), jnp.float32),    # per-head attention accumulator
            ],
        ),
        compiler_params=pltpu.CompilerParams(
            dimension_semantics=("parallel", "parallel", "arbitrary"),
            vmem_limit_bytes=vmem_limit),
    )(qi_tab, kv_tab, q, k, v)

    # ------------------- kernel 3: output projection, grid (B, n_t) -------------------
    out = pl.pallas_call(
        functools.partial(_out_proj_kernel, n_head=H, head_dim=D),
        out_shape=jax.ShapeDtypeStruct((B, T, C), x.dtype),
        grid_spec=pltpu.PrefetchScalarGridSpec(
            num_scalar_prefetch=0,
            grid=(B, n_t),
            in_specs=[
                pl.BlockSpec((None, H, blk_t, D), lambda b, tb: (b, 0, tb, 0)),  # y
                pl.BlockSpec((C, C), lambda b, tb: (0, 0)),                      # Wproj (resident)
                pl.BlockSpec((1, C), lambda b, tb: (0, 0)),                      # bproj (resident)
            ],
            out_specs=pl.BlockSpec((None, blk_t, C), lambda b, tb: (b, tb, 0)),
        ),
        compiler_params=pltpu.CompilerParams(
            dimension_semantics=("parallel", "parallel"),
            vmem_limit_bytes=vmem_limit),
    )(y, wproj_c, bproj_f)

    return out


# --------------------------------------------------------------------------------------
# Pure-JAX reference mirroring the PyTorch forward (fp32)
# --------------------------------------------------------------------------------------
def reference_attention(x, wqkv, bqkv, wproj, bproj, n_head):
    B, T, C = x.shape
    D = C // n_head
    qkv = x @ wqkv + bqkv[0]
    q, k, v = jnp.split(qkv, 3, axis=-1)
    q = q.reshape(B, T, n_head, D).transpose(0, 2, 1, 3)
    k = k.reshape(B, T, n_head, D).transpose(0, 2, 1, 3)
    v = v.reshape(B, T, n_head, D).transpose(0, 2, 1, 3)
    scores = (q @ k.transpose(0, 1, 3, 2)) / math.sqrt(D)
    mask = jnp.tril(jnp.ones((T, T), dtype=bool))
    scores = jnp.where(mask, scores, jnp.finfo(jnp.float32).min)
    attn = jax.nn.softmax(scores, axis=-1)
    y = (attn @ v).transpose(0, 2, 1, 3).reshape(B, T, C)
    return y @ wproj + bproj[0]


if __name__ == "__main__":
    def run_case(B, T, C, n_head, atol):
        key = jax.random.PRNGKey(0)
        kx, k1, k2, k3, k4 = jax.random.split(key, 5)
        x = jax.random.normal(kx, (B, T, C), dtype=jnp.float32)
        wqkv = 0.02 * jax.random.normal(k1, (C, 3 * C), dtype=jnp.float32)
        bqkv = 0.02 * jax.random.normal(k2, (1, 3 * C), dtype=jnp.float32)
        wproj = 0.02 * jax.random.normal(k3, (C, C), dtype=jnp.float32)
        bproj = 0.02 * jax.random.normal(k4, (1, C), dtype=jnp.float32)

        out = causal_attention(x, wqkv, bqkv, wproj, bproj,
                               n_head=n_head, compute_dtype=jnp.bfloat16)
        out = jax.block_until_ready(out)

        ref = reference_attention(x, wqkv, bqkv, wproj, bproj, n_head)
        assert out.shape == (B, T, C)
        # bf16 MXU inputs (fp32 accumulate) + approx reciprocal -> loosened tolerance
        assert jnp.allclose(out, ref, atol=atol, rtol=5e-2), \
            f"mismatch vs reference for (B={B}, T={T}, C={C}, H={n_head})"

    # Small config: block_size (=T) 8, n_embd 32, n_head 4, batch 2.
    run_case(B=2, T=8, C=32, n_head=4, atol=1e-2)
    # Multi-block config exercising the triangular grid, 512-wide tiles and head_dim 64.
    run_case(B=2, T=1024, C=256, n_head=4, atol=2e-2)

    print("KERNEL_OK")
</pallas_src>

<mosaic_0001>
module attributes {stable_mosaic.version = 11 : i64} {
  func.func @_qkv_proj_kernel(%arg0: i32, %arg1: i32, %arg2: memref<1x8x32xf32, #tpu.memory_space<vmem>>, %arg3: memref<32x96xbf16, #tpu.memory_space<vmem>>, %arg4: memref<1x96xf32, #tpu.memory_space<vmem>>, %arg5: memref<1x4x8x8xbf16, #tpu.memory_space<vmem>>, %arg6: memref<1x4x8x8xbf16, #tpu.memory_space<vmem>>, %arg7: memref<1x4x8x8xbf16, #tpu.memory_space<vmem>>) attributes {dimension_semantics = [#tpu.dimension_semantics<parallel>, #tpu.dimension_semantics<parallel>], iteration_bounds = array<i64: 2, 1>, scalar_prefetch = 0 : i64, scratch_operands = 0 : i64, tpu.core_type = #tpu.core_type<tc>, window_params = [{transform_indices = @transform_0, window_bounds = array<i64: 1, 8, 32>}, {pipeline_mode = #tpu.pipeline_mode<synchronous>, transform_indices = @transform_1, window_bounds = array<i64: 32, 96>}, {pipeline_mode = #tpu.pipeline_mode<synchronous>, transform_indices = @transform_2, window_bounds = array<i64: 1, 96>}, {transform_indices = @transform_3, window_bounds = array<i64: 1, 4, 8, 8>}, {transform_indices = @transform_4, window_bounds = array<i64: 1, 4, 8, 8>}, {transform_indices = @transform_5, window_bounds = array<i64: 1, 4, 8, 8>}]} {
    %c0 = arith.constant 0 : index
    %c0_0 = arith.constant 0 : index
    %c0_1 = arith.constant 0 : index
    %0 = vector.load %arg2[%c0, %c0_0, %c0_1] : memref<1x8x32xf32, #tpu.memory_space<vmem>>, vector<1x8x32xf32>
    %1 = vector.shape_cast %0 : vector<1x8x32xf32> to vector<8x32xf32>
    %2 = arith.truncf %1 : vector<8x32xf32> to vector<8x32xbf16>
    %c0_2 = arith.constant 0 : index
    %c0_3 = arith.constant 0 : index
    %3 = vector.load %arg3[%c0_2, %c0_3] : memref<32x96xbf16, #tpu.memory_space<vmem>>, vector<32x96xbf16>
    %cst = arith.constant dense<0.000000e+00> : vector<8x96xf32>
    %4 = tpu.matmul %2, %3, %cst {dimension_numbers = #tpu.dot_dimension_numbers<[1], [0], [0], [1], [0, 0, 1, 1], [], []>} : vector<8x32xbf16>, vector<32x96xbf16>, vector<8x96xf32> -> vector<8x96xf32>
    %c0_4 = arith.constant 0 : index
    %c0_5 = arith.constant 0 : index
    %5 = vector.load %arg4[%c0_4, %c0_5] : memref<1x96xf32, #tpu.memory_space<vmem>>, vector<1x96xf32>
    %6 = vector.broadcast %5 : vector<1x96xf32> to vector<8x96xf32>
    %7 = arith.addf %4, %6 : vector<8x96xf32>
    %8 = vector.extract_strided_slice %7 {offsets = [0, 0], sizes = [8, 8], strides = [1, 1]} : vector<8x96xf32> to vector<8x8xf32>
    %9 = arith.truncf %8 : vector<8x8xf32> to vector<8x8xbf16>
    %c0_6 = arith.constant 0 : index
    %c0_7 = arith.constant 0 : index
    %c0_8 = arith.constant 0 : index
    %c0_9 = arith.constant 0 : index
    %10 = vector.load %arg5[%c0_6, %c0_7, %c0_8, %c0_9] : memref<1x4x8x8xbf16, #tpu.memory_space<vmem>>, vector<1x1x8x8xbf16>
    %11 = vector.shape_cast %10 : vector<1x1x8x8xbf16> to vector<8x8xbf16>
    %12 = vector.shape_cast %9 : vector<8x8xbf16> to vector<1x1x8x8xbf16>
    tpu.vector_store %arg5[%c0_6, %c0_7, %c0_8, %c0_9], %12 {strides = array<i32>} : memref<1x4x8x8xbf16, #tpu.memory_space<vmem>>, vector<1x1x8x8xbf16>,
    %13 = vector.extract_strided_slice %7 {offsets = [0, 32], sizes = [8, 8], strides = [1, 1]} : vector<8x96xf32> to vector<8x8xf32>
    %14 = arith.truncf %13 : vector<8x8xf32> to vector<8x8xbf16>
    %c0_10 = arith.constant 0 : index
    %c0_11 = arith.constant 0 : index
    %c0_12 = arith.constant 0 : index
    %c0_13 = arith.constant 0 : index
    %15 = vector.load %arg6[%c0_10, %c0_11, %c0_12, %c0_13] : memref<1x4x8x8xbf16, #tpu.memory_space<vmem>>, vector<1x1x8x8xbf16>
    %16 = vector.shape_cast %15 : vector<1x1x8x8xbf16> to vector<8x8xbf16>
    %17 = vector.shape_cast %14 : vector<8x8xbf16> to vector<1x1x8x8xbf16>
    tpu.vector_store %arg6[%c0_10, %c0_11, %c0_12, %c0_13], %17 {strides = array<i32>} : memref<1x4x8x8xbf16, #tpu.memory_space<vmem>>, vector<1x1x8x8xbf16>,
    %18 = vector.extract_strided_slice %7 {offsets = [0, 64], sizes = [8, 8], strides = [1, 1]} : vector<8x96xf32> to vector<8x8xf32>
    %19 = arith.truncf %18 : vector<8x8xf32> to vector<8x8xbf16>
    %c0_14 = arith.constant 0 : index
    %c0_15 = arith.constant 0 : index
    %c0_16 = arith.constant 0 : index
    %c0_17 = arith.constant 0 : index
    %20 = vector.load %arg7[%c0_14, %c0_15, %c0_16, %c0_17] : memref<1x4x8x8xbf16, #tpu.memory_space<vmem>>, vector<1x1x8x8xbf16>
    %21 = vector.shape_cast %20 : vector<1x1x8x8xbf16> to vector<8x8xbf16>
    %22 = vector.shape_cast %19 : vector<8x8xbf16> to vector<1x1x8x8xbf16>
    tpu.vector_store %arg7[%c0_14, %c0_15, %c0_16, %c0_17], %22 {strides = array<i32>} : memref<1x4x8x8xbf16, #tpu.memory_space<vmem>>, vector<1x1x8x8xbf16>,
    %23 = vector.extract_strided_slice %7 {offsets = [0, 8], sizes = [8, 8], strides = [1, 1]} : vector<8x96xf32> to vector<8x8xf32>
    %24 = arith.truncf %23 : vector<8x8xf32> to vector<8x8xbf16>
    %c0_18 = arith.constant 0 : index
    %c1 = arith.constant 1 : index
    %c0_19 = arith.constant 0 : index
    %c0_20 = arith.constant 0 : index
    %25 = vector.load %arg5[%c0_18, %c1, %c0_19, %c0_20] : memref<1x4x8x8xbf16, #tpu.memory_space<vmem>>, vector<1x1x8x8xbf16>
    %26 = vector.shape_cast %25 : vector<1x1x8x8xbf16> to vector<8x8xbf16>
    %27 = vector.shape_cast %24 : vector<8x8xbf16> to vector<1x1x8x8xbf16>
    tpu.vector_store %arg5[%c0_18, %c1, %c0_19, %c0_20], %27 {strides = array<i32>} : memref<1x4x8x8xbf16, #tpu.memory_space<vmem>>, vector<1x1x8x8xbf16>,
    %28 = vector.extract_strided_slice %7 {offsets = [0, 40], sizes = [8, 8], strides = [1, 1]} : vector<8x96xf32> to vector<8x8xf32>
    %29 = arith.truncf %28 : vector<8x8xf32> to vector<8x8xbf16>
    %c0_21 = arith.constant 0 : index
    %c1_22 = arith.constant 1 : index
    %c0_23 = arith.constant 0 : index
    %c0_24 = arith.constant 0 : index
    %30 = vector.load %arg6[%c0_21, %c1_22, %c0_23, %c0_24] : memref<1x4x8x8xbf16, #tpu.memory_space<vmem>>, vector<1x1x8x8xbf16>
    %31 = vector.shape_cast %30 : vector<1x1x8x8xbf16> to vector<8x8xbf16>
    %32 = vector.shape_cast %29 : vector<8x8xbf16> to vector<1x1x8x8xbf16>
    tpu.vector_store %arg6[%c0_21, %c1_22, %c0_23, %c0_24], %32 {strides = array<i32>} : memref<1x4x8x8xbf16, #tpu.memory_space<vmem>>, vector<1x1x8x8xbf16>,
    %33 = vector.extract_strided_slice %7 {offsets = [0, 72], sizes = [8, 8], strides = [1, 1]} : vector<8x96xf32> to vector<8x8xf32>
    %34 = arith.truncf %33 : vector<8x8xf32> to vector<8x8xbf16>
    %c0_25 = arith.constant 0 : index
    %c1_26 = arith.constant 1 : index
    %c0_27 = arith.constant 0 : index
    %c0_28 = arith.constant 0 : index
    %35 = vector.load %arg7[%c0_25, %c1_26, %c0_27, %c0_28] : memref<1x4x8x8xbf16, #tpu.memory_space<vmem>>, vector<1x1x8x8xbf16>
    %36 = vector.shape_cast %35 : vector<1x1x8x8xbf16> to vector<8x8xbf16>
    %37 = vector.shape_cast %34 : vector<8x8xbf16> to vector<1x1x8x8xbf16>
    tpu.vector_store %arg7[%c0_25, %c1_26, %c0_27, %c0_28], %37 {strides = array<i32>} : memref<1x4x8x8xbf16, #tpu.memory_space<vmem>>, vector<1x1x8x8xbf16>,
    %38 = vector.extract_strided_slice %7 {offsets = [0, 16], sizes = [8, 8], strides = [1, 1]} : vector<8x96xf32> to vector<8x8xf32>
    %39 = arith.truncf %38 : vector<8x8xf32> to vector<8x8xbf16>
    %c0_29 = arith.constant 0 : index
    %c2 = arith.constant 2 : index
    %c0_30 = arith.constant 0 : index
    %c0_31 = arith.constant 0 : index
    %40 = vector.load %arg5[%c0_29, %c2, %c0_30, %c0_31] : memref<1x4x8x8xbf16, #tpu.memory_space<vmem>>, vector<1x1x8x8xbf16>
    %41 = vector.shape_cast %40 : vector<1x1x8x8xbf16> to vector<8x8xbf16>
    %42 = vector.shape_cast %39 : vector<8x8xbf16> to vector<1x1x8x8xbf16>
    tpu.vector_store %arg5[%c0_29, %c2, %c0_30, %c0_31], %42 {strides = array<i32>} : memref<1x4x8x8xbf16, #tpu.memory_space<vmem>>, vector<1x1x8x8xbf16>,
    %43 = vector.extract_strided_slice %7 {offsets = [0, 48], sizes = [8, 8], strides = [1, 1]} : vector<8x96xf32> to vector<8x8xf32>
    %44 = arith.truncf %43 : vector<8x8xf32> to vector<8x8xbf16>
    %c0_32 = arith.constant 0 : index
    %c2_33 = arith.constant 2 : index
    %c0_34 = arith.constant 0 : index
    %c0_35 = arith.constant 0 : index
    %45 = vector.load %arg6[%c0_32, %c2_33, %c0_34, %c0_35] : memref<1x4x8x8xbf16, #tpu.memory_space<vmem>>, vector<1x1x8x8xbf16>
    %46 = vector.shape_cast %45 : vector<1x1x8x8xbf16> to vector<8x8xbf16>
    %47 = vector.shape_cast %44 : vector<8x8xbf16> to vector<1x1x8x8xbf16>
    tpu.vector_store %arg6[%c0_32, %c2_33, %c0_34, %c0_35], %47 {strides = array<i32>} : memref<1x4x8x8xbf16, #tpu.memory_space<vmem>>, vector<1x1x8x8xbf16>,
    %48 = vector.extract_strided_slice %7 {offsets = [0, 80], sizes = [8, 8], strides = [1, 1]} : vector<8x96xf32> to vector<8x8xf32>
    %49 = arith.truncf %48 : vector<8x8xf32> to vector<8x8xbf16>
    %c0_36 = arith.constant 0 : index
    %c2_37 = arith.constant 2 : index
    %c0_38 = arith.constant 0 : index
    %c0_39 = arith.constant 0 : index
    %50 = vector.load %arg7[%c0_36, %c2_37, %c0_38, %c0_39] : memref<1x4x8x8xbf16, #tpu.memory_space<vmem>>, vector<1x1x8x8xbf16>
    %51 = vector.shape_cast %50 : vector<1x1x8x8xbf16> to vector<8x8xbf16>
    %52 = vector.shape_cast %49 : vector<8x8xbf16> to vector<1x1x8x8xbf16>
    tpu.vector_store %arg7[%c0_36, %c2_37, %c0_38, %c0_39], %52 {strides = array<i32>} : memref<1x4x8x8xbf16, #tpu.memory_space<vmem>>, vector<1x1x8x8xbf16>,
    %53 = vector.extract_strided_slice %7 {offsets = [0, 24], sizes = [8, 8], strides = [1, 1]} : vector<8x96xf32> to vector<8x8xf32>
    %54 = arith.truncf %53 : vector<8x8xf32> to vector<8x8xbf16>
    %c0_40 = arith.constant 0 : index
    %c3 = arith.constant 3 : index
    %c0_41 = arith.constant 0 : index
    %c0_42 = arith.constant 0 : index
    %55 = vector.load %arg5[%c0_40, %c3, %c0_41, %c0_42] : memref<1x4x8x8xbf16, #tpu.memory_space<vmem>>, vector<1x1x8x8xbf16>
    %56 = vector.shape_cast %55 : vector<1x1x8x8xbf16> to vector<8x8xbf16>
    %57 = vector.shape_cast %54 : vector<8x8xbf16> to vector<1x1x8x8xbf16>
    tpu.vector_store %arg5[%c0_40, %c3, %c0_41, %c0_42], %57 {strides = array<i32>} : memref<1x4x8x8xbf16, #tpu.memory_space<vmem>>, vector<1x1x8x8xbf16>,
    %58 = vector.extract_strided_slice %7 {offsets = [0, 56], sizes = [8, 8], strides = [1, 1]} : vector<8x96xf32> to vector<8x8xf32>
    %59 = arith.truncf %58 : vector<8x8xf32> to vector<8x8xbf16>
    %c0_43 = arith.constant 0 : index
    %c3_44 = arith.constant 3 : index
    %c0_45 = arith.constant 0 : index
    %c0_46 = arith.constant 0 : index
    %60 = vector.load %arg6[%c0_43, %c3_44, %c0_45, %c0_46] : memref<1x4x8x8xbf16, #tpu.memory_space<vmem>>, vector<1x1x8x8xbf16>
    %61 = vector.shape_cast %60 : vector<1x1x8x8xbf16> to vector<8x8xbf16>
    %62 = vector.shape_cast %59 : vector<8x8xbf16> to vector<1x1x8x8xbf16>
    tpu.vector_store %arg6[%c0_43, %c3_44, %c0_45, %c0_46], %62 {strides = array<i32>} : memref<1x4x8x8xbf16, #tpu.memory_space<vmem>>, vector<1x1x8x8xbf16>,
    %63 = vector.extract_strided_slice %7 {offsets = [0, 88], sizes = [8, 8], strides = [1, 1]} : vector<8x96xf32> to vector<8x8xf32>
    %64 = arith.truncf %63 : vector<8x8xf32> to vector<8x8xbf16>
    %c0_47 = arith.constant 0 : index
    %c3_48 = arith.constant 3 : index
    %c0_49 = arith.constant 0 : index
    %c0_50 = arith.constant 0 : index
    %65 = vector.load %arg7[%c0_47, %c3_48, %c0_49, %c0_50] : memref<1x4x8x8xbf16, #tpu.memory_space<vmem>>, vector<1x1x8x8xbf16>
    %66 = vector.shape_cast %65 : vector<1x1x8x8xbf16> to vector<8x8xbf16>
    %67 = vector.shape_cast %64 : vector<8x8xbf16> to vector<1x1x8x8xbf16>
    tpu.vector_store %arg7[%c0_47, %c3_48, %c0_49, %c0_50], %67 {strides = array<i32>} : memref<1x4x8x8xbf16, #tpu.memory_space<vmem>>, vector<1x1x8x8xbf16>,
    return
  }
  func.func @transform_0(%arg0: i32, %arg1: i32) -> (i32, i32, i32) {
    %c0_i32 = arith.constant 0 : i32
    %c0_i32_0 = arith.constant 0 : i32
    return %arg0, %arg1, %c0_i32 : i32, i32, i32
  }
  func.func @transform_1(%arg0: i32, %arg1: i32) -> (i32, i32) {
    %c0_i32 = arith.constant 0 : i32
    %c0_i32_0 = arith.constant 0 : i32
    %c0_i32_1 = arith.constant 0 : i32
    return %c0_i32, %c0_i32_0 : i32, i32
  }
  func.func @transform_2(%arg0: i32, %arg1: i32) -> (i32, i32) {
    %c0_i32 = arith.constant 0 : i32
    %c0_i32_0 = arith.constant 0 : i32
    %c0_i32_1 = arith.constant 0 : i32
    return %c0_i32, %c0_i32_0 : i32, i32
  }
  func.func @transform_3(%arg0: i32, %arg1: i32) -> (i32, i32, i32, i32) {
    %c0_i32 = arith.constant 0 : i32
    %c0_i32_0 = arith.constant 0 : i32
    %c0_i32_1 = arith.constant 0 : i32
    return %arg0, %c0_i32, %arg1, %c0_i32_0 : i32, i32, i32, i32
  }
  func.func @transform_4(%arg0: i32, %arg1: i32) -> (i32, i32, i32, i32) {
    %c0_i32 = arith.constant 0 : i32
    %c0_i32_0 = arith.constant 0 : i32
    %c0_i32_1 = arith.constant 0 : i32
    return %arg0, %c0_i32, %arg1, %c0_i32_0 : i32, i32, i32, i32
  }
  func.func @transform_5(%arg0: i32, %arg1: i32) -> (i32, i32, i32, i32) {
    %c0_i32 = arith.constant 0 : i32
    %c0_i32_0 = arith.constant 0 : i32
    %c0_i32_1 = arith.constant 0 : i32
    return %arg0, %c0_i32, %arg1, %c0_i32_0 : i32, i32, i32, i32
  }
}

module attributes {stable_mosaic.version = 11 : i64} {
  func.func @_out_proj_kernel(%arg0: i32, %arg1: i32, %arg2: memref<1x4x8x8xbf16, #tpu.memory_space<vmem>>, %arg3: memref<32x32xbf16, #tpu.memory_space<vmem>>, %arg4: memref<1x32xf32, #tpu.memory_space<vmem>>, %arg5: memref<1x8x32xf32, #tpu.memory_space<vmem>>) attributes {dimension_semantics = [#tpu.dimension_semantics<parallel>, #tpu.dimension_semantics<parallel>], iteration_bounds = array<i64: 2, 1>, scalar_prefetch = 0 : i64, scratch_operands = 0 : i64, tpu.core_type = #tpu.core_type<tc>, window_params = [{transform_indices = @transform_0, window_bounds = array<i64: 1, 4, 8, 8>}, {pipeline_mode = #tpu.pipeline_mode<synchronous>, transform_indices = @transform_1, window_bounds = array<i64: 32, 32>}, {pipeline_mode = #tpu.pipeline_mode<synchronous>, transform_indices = @transform_2, window_bounds = array<i64: 1, 32>}, {transform_indices = @transform_3, window_bounds = array<i64: 1, 8, 32>}]} {
    %cst = arith.constant 0.000000e+00 : f32
    %0 = vector.broadcast %cst : f32 to vector<8x32xf32>
    %c0 = arith.constant 0 : index
    %c0_0 = arith.constant 0 : index
    %c0_1 = arith.constant 0 : index
    %c0_2 = arith.constant 0 : index
    %1 = vector.load %arg2[%c0, %c0_0, %c0_1, %c0_2] : memref<1x4x8x8xbf16, #tpu.memory_space<vmem>>, vector<1x1x8x8xbf16>
    %2 = vector.shape_cast %1 : vector<1x1x8x8xbf16> to vector<8x8xbf16>
    %c0_3 = arith.constant 0 : index
    %c0_4 = arith.constant 0 : index
    %3 = vector.load %arg3[%c0_3, %c0_4] : memref<32x32xbf16, #tpu.memory_space<vmem>>, vector<8x32xbf16>
    %cst_5 = arith.constant dense<0.000000e+00> : vector<8x32xf32>
    %4 = tpu.matmul %2, %3, %cst_5 {dimension_numbers = #tpu.dot_dimension_numbers<[1], [0], [0], [1], [0, 0, 1, 1], [], []>} : vector<8x8xbf16>, vector<8x32xbf16>, vector<8x32xf32> -> vector<8x32xf32>
    %5 = arith.addf %0, %4 : vector<8x32xf32>
    %c0_6 = arith.constant 0 : index
    %c1 = arith.constant 1 : index
    %c0_7 = arith.constant 0 : index
    %c0_8 = arith.constant 0 : index
    %6 = vector.load %arg2[%c0_6, %c1, %c0_7, %c0_8] : memref<1x4x8x8xbf16, #tpu.memory_space<vmem>>, vector<1x1x8x8xbf16>
    %7 = vector.shape_cast %6 : vector<1x1x8x8xbf16> to vector<8x8xbf16>
    %c8 = arith.constant 8 : index
    %c0_9 = arith.constant 0 : index
    %8 = vector.load %arg3[%c8, %c0_9] : memref<32x32xbf16, #tpu.memory_space<vmem>>, vector<8x32xbf16>
    %cst_10 = arith.constant dense<0.000000e+00> : vector<8x32xf32>
    %9 = tpu.matmul %7, %8, %cst_10 {dimension_numbers = #tpu.dot_dimension_numbers<[1], [0], [0], [1], [0, 0, 1, 1], [], []>} : vector<8x8xbf16>, vector<8x32xbf16>, vector<8x32xf32> -> vector<8x32xf32>
    %10 = arith.addf %5, %9 : vector<8x32xf32>
    %c0_11 = arith.constant 0 : index
    %c2 = arith.constant 2 : index
    %c0_12 = arith.constant 0 : index
    %c0_13 = arith.constant 0 : index
    %11 = vector.load %arg2[%c0_11, %c2, %c0_12, %c0_13] : memref<1x4x8x8xbf16, #tpu.memory_space<vmem>>, vector<1x1x8x8xbf16>
    %12 = vector.shape_cast %11 : vector<1x1x8x8xbf16> to vector<8x8xbf16>
    %c16 = arith.constant 16 : index
    %c0_14 = arith.constant 0 : index
    %13 = vector.load %arg3[%c16, %c0_14] : memref<32x32xbf16, #tpu.memory_space<vmem>>, vector<8x32xbf16>
    %cst_15 = arith.constant dense<0.000000e+00> : vector<8x32xf32>
    %14 = tpu.matmul %12, %13, %cst_15 {dimension_numbers = #tpu.dot_dimension_numbers<[1], [0], [0], [1], [0, 0, 1, 1], [], []>} : vector<8x8xbf16>, vector<8x32xbf16>, vector<8x32xf32> -> vector<8x32xf32>
    %15 = arith.addf %10, %14 : vector<8x32xf32>
    %c0_16 = arith.constant 0 : index
    %c3 = arith.constant 3 : index
    %c0_17 = arith.constant 0 : index
    %c0_18 = arith.constant 0 : index
    %16 = vector.load %arg2[%c0_16, %c3, %c0_17, %c0_18] : memref<1x4x8x8xbf16, #tpu.memory_space<vmem>>, vector<1x1x8x8xbf16>
    %17 = vector.shape_cast %16 : vector<1x1x8x8xbf16> to vector<8x8xbf16>
    %c24 = arith.constant 24 : index
    %c0_19 = arith.constant 0 : index
    %18 = vector.load %arg3[%c24, %c0_19] : memref<32x32xbf16, #tpu.memory_space<vmem>>, vector<8x32xbf16>
    %cst_20 = arith.constant dense<0.000000e+00> : vector<8x32xf32>
    %19 = tpu.matmul %17, %18, %cst_20 {dimension_numbers = #tpu.dot_dimension_numbers<[1], [0], [0], [1], [0, 0, 1, 1], [], []>} : vector<8x8xbf16>, vector<8x32xbf16>, vector<8x32xf32> -> vector<8x32xf32>
    %20 = arith.addf %15, %19 : vector<8x32xf32>
    %c0_21 = arith.constant 0 : index
    %c0_22 = arith.constant 0 : index
    %21 = vector.load %arg4[%c0_21, %c0_22] : memref<1x32xf32, #tpu.memory_space<vmem>>, vector<1x32xf32>
    %22 = vector.broadcast %21 : vector<1x32xf32> to vector<8x32xf32>
    %23 = arith.addf %20, %22 : vector<8x32xf32>
    %c0_23 = arith.constant 0 : index
    %c0_24 = arith.constant 0 : index
    %c0_25 = arith.constant 0 : index
    %24 = vector.load %arg5[%c0_23, %c0_24, %c0_25] : memref<1x8x32xf32, #tpu.memory_space<vmem>>, vector<1x8x32xf32>
    %25 = vector.shape_cast %24 : vector<1x8x32xf32> to vector<8x32xf32>
    %26 = vector.shape_cast %23 : vector<8x32xf32> to vector<1x8x32xf32>
    tpu.vector_store %arg5[%c0_23, %c0_24, %c0_25], %26 {strides = array<i32>} : memref<1x8x32xf32, #tpu.memory_space<vmem>>, vector<1x8x32xf32>,
    return
  }
  func.func @transform_0(%arg0: i32, %arg1: i32) -> (i32, i32, i32, i32) {
    %c0_i32 = arith.constant 0 : i32
    %c0_i32_0 = arith.constant 0 : i32
    %c0_i32_1 = arith.constant 0 : i32
    return %arg0, %c0_i32, %arg1, %c0_i32_0 : i32, i32, i32, i32
  }
  func.func @transform_1(%arg0: i32, %arg1: i32) -> (i32, i32) {
    %c0_i32 = arith.constant 0 : i32
    %c0_i32_0 = arith.constant 0 : i32
    %c0_i32_1 = arith.constant 0 : i32
    return %c0_i32, %c0_i32_0 : i32, i32
  }
  func.func @transform_2(%arg0: i32, %arg1: i32) -> (i32, i32) {
    %c0_i32 = arith.constant 0 : i32
    %c0_i32_0 = arith.constant 0 : i32
    %c0_i32_1 = arith.constant 0 : i32
    return %c0_i32, %c0_i32_0 : i32, i32
  }
  func.func @transform_3(%arg0: i32, %arg1: i32) -> (i32, i32, i32) {
    %c0_i32 = arith.constant 0 : i32
    %c0_i32_0 = arith.constant 0 : i32
    return %arg0, %arg1, %c0_i32 : i32, i32, i32
  }
}

module attributes {stable_mosaic.version = 11 : i64} {
  func.func @_flash_attn_kernel(%arg0: i32, %arg1: i32, %arg2: i32, %arg3: memref<1xi32, #tpu.memory_space<smem>>, %arg4: memref<1xi32, #tpu.memory_space<smem>>, %arg5: memref<1x1x8x8xbf16, #tpu.memory_space<vmem>>, %arg6: memref<1x1x8x8xbf16, #tpu.memory_space<vmem>>, %arg7: memref<1x1x8x8xbf16, #tpu.memory_space<vmem>>, %arg8: memref<1x1x8x8xbf16, #tpu.memory_space<vmem>>, %arg9: memref<8x1xf32, #tpu.memory_space<vmem>>, %arg10: memref<8x1xf32, #tpu.memory_space<vmem>>, %arg11: memref<8x8xf32, #tpu.memory_space<vmem>>) attributes {dimension_semantics = [#tpu.dimension_semantics<parallel>, #tpu.dimension_semantics<parallel>, #tpu.dimension_semantics<arbitrary>], iteration_bounds = array<i64: 2, 4, 1>, scalar_prefetch = 2 : i64, scratch_operands = 3 : i64, tpu.core_type = #tpu.core_type<tc>, window_params = [{transform_indices = @transform_0, window_bounds = array<i64: 1, 1, 8, 8>}, {transform_indices = @transform_1, window_bounds = array<i64: 1, 1, 8, 8>}, {transform_indices = @transform_2, window_bounds = array<i64: 1, 1, 8, 8>}, {transform_indices = @transform_3, window_bounds = array<i64: 1, 1, 8, 8>}]} {
    %0 = arith.index_cast %arg2 : i32 to index
    %1 = memref.load %arg3[%0] : memref<1xi32, #tpu.memory_space<smem>>
    %2 = arith.index_cast %arg2 : i32 to index
    %3 = memref.load %arg4[%2] : memref<1xi32, #tpu.memory_space<smem>>
    %c0_i32 = arith.constant 0 : i32
    %4 = arith.cmpi eq, %3, %c0_i32 : i32
    %5 = arith.extui %4 : i1 to i32
    %c0_i32_0 = arith.constant 0 : i32
    %6 = arith.cmpi ne, %5, %c0_i32_0 : i32
    scf.if %6 {
      %cst = arith.constant -1.000000e+30 : f32
      %13 = vector.broadcast %cst : f32 to vector<8x1xf32>
      %c0 = arith.constant 0 : index
      %c0_3 = arith.constant 0 : index
      %14 = vector.load %arg9[%c0, %c0_3] : memref<8x1xf32, #tpu.memory_space<vmem>>, vector<8x1xf32>
      tpu.vector_store %arg9[%c0, %c0_3], %13 {strides = array<i32>} : memref<8x1xf32, #tpu.memory_space<vmem>>, vector<8x1xf32>,
      %cst_4 = arith.constant 0.000000e+00 : f32
      %15 = vector.broadcast %cst_4 : f32 to vector<8x1xf32>
      %c0_5 = arith.constant 0 : index
      %c0_6 = arith.constant 0 : index
      %16 = vector.load %arg10[%c0_5, %c0_6] : memref<8x1xf32, #tpu.memory_space<vmem>>, vector<8x1xf32>
      tpu.vector_store %arg10[%c0_5, %c0_6], %15 {strides = array<i32>} : memref<8x1xf32, #tpu.memory_space<vmem>>, vector<8x1xf32>,
      %cst_7 = arith.constant 0.000000e+00 : f32
      %17 = vector.broadcast %cst_7 : f32 to vector<8x8xf32>
      %c0_8 = arith.constant 0 : index
      %c0_9 = arith.constant 0 : index
      %18 = vector.load %arg11[%c0_8, %c0_9] : memref<8x8xf32, #tpu.memory_space<vmem>>, vector<8x8xf32>
      tpu.vector_store %arg11[%c0_8, %c0_9], %17 {strides = array<i32>} : memref<8x8xf32, #tpu.memory_space<vmem>>, vector<8x8xf32>,
    } else {
    }
    %7 = arith.cmpi eq, %3, %1 : i32
    %true = arith.constant true
    %8 = arith.xori %7, %true : i1
    %9 = arith.extui %8 : i1 to i32
    %c0_i32_1 = arith.constant 0 : i32
    %10 = arith.cmpi ne, %9, %c0_i32_1 : i32
    scf.if %10 {
      %c0 = arith.constant 0 : index
      %c0_3 = arith.constant 0 : index
      %c0_4 = arith.constant 0 : index
      %c0_5 = arith.constant 0 : index
      %13 = vector.load %arg5[%c0, %c0_3, %c0_4, %c0_5] : memref<1x1x8x8xbf16, #tpu.memory_space<vmem>>, vector<1x1x8x8xbf16>
      %14 = vector.shape_cast %13 : vector<1x1x8x8xbf16> to vector<8x8xbf16>
      %c0_6 = arith.constant 0 : index
      %c0_7 = arith.constant 0 : index
      %c0_8 = arith.constant 0 : index
      %c0_9 = arith.constant 0 : index
      %15 = vector.load %arg6[%c0_6, %c0_7, %c0_8, %c0_9] : memref<1x1x8x8xbf16, #tpu.memory_space<vmem>>, vector<1x1x8x8xbf16>
      %16 = vector.shape_cast %15 : vector<1x1x8x8xbf16> to vector<8x8xbf16>
      %cst = arith.constant dense<0.000000e+00> : vector<8x8xf32>
      %17 = tpu.matmul %14, %16, %cst {dimension_numbers = #tpu.dot_dimension_numbers<[1], [1], [0], [0], [0, 0, 1, 0], [], []>} : vector<8x8xbf16>, vector<8x8xbf16>, vector<8x8xf32> -> vector<8x8xf32>
      %c0_10 = arith.constant 0 : index
      %c0_11 = arith.constant 0 : index
      %18 = vector.load %arg9[%c0_10, %c0_11] : memref<8x1xf32, #tpu.memory_space<vmem>>, vector<8x1xf32>
      %cst_12 = arith.constant dense<0xFF800000> : vector<8xf32>
      %19 = vector.multi_reduction <maximumf>, %17, %cst_12 [1] : vector<8x8xf32> to vector<8xf32>
      %20 = vector.shape_cast %19 : vector<8xf32> to vector<8x1xf32>
      %21 = arith.maximumf %18, %20 : vector<8x1xf32>
      %22 = arith.subf %18, %21 : vector<8x1xf32>
      %23 = math.exp %22 : vector<8x1xf32>
      %24 = vector.broadcast %21 : vector<8x1xf32> to vector<8x8xf32>
      %25 = arith.subf %17, %24 : vector<8x8xf32>
      %26 = math.exp %25 : vector<8x8xf32>
      %c0_13 = arith.constant 0 : index
      %c0_14 = arith.constant 0 : index
      %27 = vector.load %arg10[%c0_13, %c0_14] : memref<8x1xf32, #tpu.memory_space<vmem>>, vector<8x1xf32>
      %28 = arith.mulf %23, %27 : vector<8x1xf32>
      %cst_15 = arith.constant dense<0.000000e+00> : vector<8xf32>
      %29 = vector.multi_reduction <add>, %26, %cst_15 [1] : vector<8x8xf32> to vector<8xf32>
      %30 = vector.shape_cast %29 : vector<8xf32> to vector<8x1xf32>
      %31 = arith.addf %28, %30 : vector<8x1xf32>
      %c0_16 = arith.constant 0 : index
      %c0_17 = arith.constant 0 : index
      %32 = vector.load %arg10[%c0_16, %c0_17] : memref<8x1xf32, #tpu.memory_space<vmem>>, vector<8x1xf32>
      tpu.vector_store %arg10[%c0_16, %c0_17], %31 {strides = array<i32>} : memref<8x1xf32, #tpu.memory_space<vmem>>, vector<8x1xf32>,
      %c0_18 = arith.constant 0 : index
      %c0_19 = arith.constant 0 : index
      %33 = vector.load %arg11[%c0_18, %c0_19] : memref<8x8xf32, #tpu.memory_space<vmem>>, vector<8x8xf32>
      %34 = vector.broadcast %23 : vector<8x1xf32> to vector<8x8xf32>
      %35 = arith.mulf %34, %33 : vector<8x8xf32>
      %36 = arith.truncf %26 : vector<8x8xf32> to vector<8x8xbf16>
      %c0_20 = arith.constant 0 : index
      %c0_21 = arith.constant 0 : index
      %c0_22 = arith.constant 0 : index
      %c0_23 = arith.constant 0 : index
      %37 = vector.load %arg7[%c0_20, %c0_21, %c0_22, %c0_23] : memref<1x1x8x8xbf16, #tpu.memory_space<vmem>>, vector<1x1x8x8xbf16>
      %38 = vector.shape_cast %37 : vector<1x1x8x8xbf16> to vector<8x8xbf16>
      %cst_24 = arith.constant dense<0.000000e+00> : vector<8x8xf32>
      %39 = tpu.matmul %36, %38, %cst_24 {dimension_numbers = #tpu.dot_dimension_numbers<[1], [0], [0], [1], [0, 0, 1, 1], [], []>} : vector<8x8xbf16>, vector<8x8xbf16>, vector<8x8xf32> -> vector<8x8xf32>
      %40 = arith.addf %35, %39 : vector<8x8xf32>
      %c0_25 = arith.constant 0 : index
      %c0_26 = arith.constant 0 : index
      %41 = vector.load %arg11[%c0_25, %c0_26] : memref<8x8xf32, #tpu.memory_space<vmem>>, vector<8x8xf32>
      tpu.vector_store %arg11[%c0_25, %c0_26], %40 {strides = array<i32>} : memref<8x8xf32, #tpu.memory_space<vmem>>, vector<8x8xf32>,
      %c0_27 = arith.constant 0 : index
      %c0_28 = arith.constant 0 : index
      %42 = vector.load %arg9[%c0_27, %c0_28] : memref<8x1xf32, #tpu.memory_space<vmem>>, vector<8x1xf32>
      tpu.vector_store %arg9[%c0_27, %c0_28], %21 {strides = array<i32>} : memref<8x1xf32, #tpu.memory_space<vmem>>, vector<8x1xf32>,
    } else {
    }
    %11 = arith.extui %7 : i1 to i32
    %c0_i32_2 = arith.constant 0 : i32
    %12 = arith.cmpi ne, %11, %c0_i32_2 : i32
    scf.if %12 {
      %c0 = arith.constant 0 : index
      %c0_3 = arith.constant 0 : index
      %c0_4 = arith.constant 0 : index
      %c0_5 = arith.constant 0 : index
      %13 = vector.load %arg5[%c0, %c0_3, %c0_4, %c0_5] : memref<1x1x8x8xbf16, #tpu.memory_space<vmem>>, vector<1x1x8x8xbf16>
      %14 = vector.shape_cast %13 : vector<1x1x8x8xbf16> to vector<8x8xbf16>
      %c0_6 = arith.constant 0 : index
      %c0_7 = arith.constant 0 : index
      %c0_8 = arith.constant 0 : index
      %c0_9 = arith.constant 0 : index
      %15 = vector.load %arg6[%c0_6, %c0_7, %c0_8, %c0_9] : memref<1x1x8x8xbf16, #tpu.memory_space<vmem>>, vector<1x1x8x8xbf16>
      %16 = vector.shape_cast %15 : vector<1x1x8x8xbf16> to vector<8x8xbf16>
      %cst = arith.constant dense<0.000000e+00> : vector<8x8xf32>
      %17 = tpu.matmul %14, %16, %cst {dimension_numbers = #tpu.dot_dimension_numbers<[1], [1], [0], [0], [0, 0, 1, 0], [], []>} : vector<8x8xbf16>, vector<8x8xbf16>, vector<8x8xf32> -> vector<8x8xf32>
      %18 = tpu.iota {dimensions = array<i32: 0>} : vector<8x8xi32>
      %19 = tpu.iota {dimensions = array<i32: 1>} : vector<8x8xi32>
      %20 = arith.cmpi sle, %19, %18 : vector<8x8xi32>
      %cst_10 = arith.constant -1.000000e+30 : f32
      %21 = vector.broadcast %cst_10 : f32 to vector<8x8xf32>
      %22 = arith.select %20, %17, %21 : vector<8x8xi1>, vector<8x8xf32>
      %c0_11 = arith.constant 0 : index
      %c0_12 = arith.constant 0 : index
      %23 = vector.load %arg9[%c0_11, %c0_12] : memref<8x1xf32, #tpu.memory_space<vmem>>, vector<8x1xf32>
      %cst_13 = arith.constant dense<0xFF800000> : vector<8xf32>
      %24 = vector.multi_reduction <maximumf>, %22, %cst_13 [1] : vector<8x8xf32> to vector<8xf32>
      %25 = vector.shape_cast %24 : vector<8xf32> to vector<8x1xf32>
      %26 = arith.maximumf %23, %25 : vector<8x1xf32>
      %27 = arith.subf %23, %26 : vector<8x1xf32>
      %28 = math.exp %27 : vector<8x1xf32>
      %29 = vector.broadcast %26 : vector<8x1xf32> to vector<8x8xf32>
      %30 = arith.subf %22, %29 : vector<8x8xf32>
      %31 = math.exp %30 : vector<8x8xf32>
      %c0_14 = arith.constant 0 : index
      %c0_15 = arith.constant 0 : index
      %32 = vector.load %arg10[%c0_14, %c0_15] : memref<8x1xf32, #tpu.memory_space<vmem>>, vector<8x1xf32>
      %33 = arith.mulf %28, %32 : vector<8x1xf32>
      %cst_16 = arith.constant dense<0.000000e+00> : vector<8xf32>
      %34 = vector.multi_reduction <add>, %31, %cst_16 [1] : vector<8x8xf32> to vector<8xf32>
      %35 = vector.shape_cast %34 : vector<8xf32> to vector<8x1xf32>
      %36 = arith.addf %33, %35 : vector<8x1xf32>
      %c0_17 = arith.constant 0 : index
      %c0_18 = arith.constant 0 : index
      %37 = vector.load %arg10[%c0_17, %c0_18] : memref<8x1xf32, #tpu.memory_space<vmem>>, vector<8x1xf32>
      tpu.vector_store %arg10[%c0_17, %c0_18], %36 {strides = array<i32>} : memref<8x1xf32, #tpu.memory_space<vmem>>, vector<8x1xf32>,
      %c0_19 = arith.constant 0 : index
      %c0_20 = arith.constant 0 : index
      %38 = vector.load %arg11[%c0_19, %c0_20] : memref<8x8xf32, #tpu.memory_space<vmem>>, vector<8x8xf32>
      %39 = vector.broadcast %28 : vector<8x1xf32> to vector<8x8xf32>
      %40 = arith.mulf %39, %38 : vector<8x8xf32>
      %41 = arith.truncf %31 : vector<8x8xf32> to vector<8x8xbf16>
      %c0_21 = arith.constant 0 : index
      %c0_22 = arith.constant 0 : index
      %c0_23 = arith.constant 0 : index
      %c0_24 = arith.constant 0 : index
      %42 = vector.load %arg7[%c0_21, %c0_22, %c0_23, %c0_24] : memref<1x1x8x8xbf16, #tpu.memory_space<vmem>>, vector<1x1x8x8xbf16>
      %43 = vector.shape_cast %42 : vector<1x1x8x8xbf16> to vector<8x8xbf16>
      %cst_25 = arith.constant dense<0.000000e+00> : vector<8x8xf32>
      %44 = tpu.matmul %41, %43, %cst_25 {dimension_numbers = #tpu.dot_dimension_numbers<[1], [0], [0], [1], [0, 0, 1, 1], [], []>} : vector<8x8xbf16>, vector<8x8xbf16>, vector<8x8xf32> -> vector<8x8xf32>
      %45 = arith.addf %40, %44 : vector<8x8xf32>
      %c0_26 = arith.constant 0 : index
      %c0_27 = arith.constant 0 : index
      %46 = vector.load %arg11[%c0_26, %c0_27] : memref<8x8xf32, #tpu.memory_space<vmem>>, vector<8x8xf32>
      tpu.vector_store %arg11[%c0_26, %c0_27], %45 {strides = array<i32>} : memref<8x8xf32, #tpu.memory_space<vmem>>, vector<8x8xf32>,
      %c0_28 = arith.constant 0 : index
      %c0_29 = arith.constant 0 : index
      %47 = vector.load %arg9[%c0_28, %c0_29] : memref<8x1xf32, #tpu.memory_space<vmem>>, vector<8x1xf32>
      tpu.vector_store %arg9[%c0_28, %c0_29], %26 {strides = array<i32>} : memref<8x1xf32, #tpu.memory_space<vmem>>, vector<8x1xf32>,
      %c0_30 = arith.constant 0 : index
      %c0_31 = arith.constant 0 : index
      %48 = vector.load %arg11[%c0_30, %c0_31] : memref<8x8xf32, #tpu.memory_space<vmem>>, vector<8x8xf32>
      %c0_32 = arith.constant 0 : index
      %c0_33 = arith.constant 0 : index
      %49 = vector.load %arg10[%c0_32, %c0_33] : memref<8x1xf32, #tpu.memory_space<vmem>>, vector<8x1xf32>
      %50 = tpu.reciprocal %49 {approx = true} : vector<8x1xf32> -> vector<8x1xf32>
      %51 = vector.broadcast %50 : vector<8x1xf32> to vector<8x8xf32>
      %52 = arith.mulf %48, %51 : vector<8x8xf32>
      %53 = arith.truncf %52 : vector<8x8xf32> to vector<8x8xbf16>
      %c0_34 = arith.constant 0 : index
      %c0_35 = arith.constant 0 : index
      %c0_36 = arith.constant 0 : index
      %c0_37 = arith.constant 0 : index
      %54 = vector.load %arg8[%c0_34, %c0_35, %c0_36, %c0_37] : memref<1x1x8x8xbf16, #tpu.memory_space<vmem>>, vector<1x1x8x8xbf16>
      %55 = vector.shape_cast %54 : vector<1x1x8x8xbf16> to vector<8x8xbf16>
      %56 = vector.shape_cast %53 : vector<8x8xbf16> to vector<1x1x8x8xbf16>
      tpu.vector_store %arg8[%c0_34, %c0_35, %c0_36, %c0_37], %56 {strides = array<i32>} : memref<1x1x8x8xbf16, #tpu.memory_space<vmem>>, vector<1x1x8x8xbf16>,
    } else {
    }
    return
  }
  func.func @transform_0(%arg0: i32, %arg1: i32, %arg2: i32, %arg3: memref<1xi32, #tpu.memory_space<smem>>, %arg4: memref<1xi32, #tpu.memory_space<smem>>) -> (i32, i32, i32, i32) {
    %0 = arith.index_cast %arg2 : i32 to index
    %1 = memref.load %arg3[%0] : memref<1xi32, #tpu.memory_space<smem>>
    %c0_i32 = arith.constant 0 : i32
    %c0_i32_0 = arith.constant 0 : i32
    return %arg0, %arg1, %1, %c0_i32 : i32, i32, i32, i32
  }
  func.func @transform_1(%arg0: i32, %arg1: i32, %arg2: i32, %arg3: memref<1xi32, #tpu.memory_space<smem>>, %arg4: memref<1xi32, #tpu.memory_space<smem>>) -> (i32, i32, i32, i32) {
    %0 = arith.index_cast %arg2 : i32 to index
    %1 = memref.load %arg4[%0] : memref<1xi32, #tpu.memory_space<smem>>
    %c0_i32 = arith.constant 0 : i32
    %c0_i32_0 = arith.constant 0 : i32
    return %arg0, %arg1, %1, %c0_i32 : i32, i32, i32, i32
  }
  func.func @transform_2(%arg0: i32, %arg1: i32, %arg2: i32, %arg3: memref<1xi32, #tpu.memory_space<smem>>, %arg4: memref<1xi32, #tpu.memory_space<smem>>) -> (i32, i32, i32, i32) {
    %0 = arith.index_cast %arg2 : i32 to index
    %1 = memref.load %arg4[%0] : memref<1xi32, #tpu.memory_space<smem>>
    %c0_i32 = arith.constant 0 : i32
    %c0_i32_0 = arith.constant 0 : i32
    return %arg0, %arg1, %1, %c0_i32 : i32, i32, i32, i32
  }
  func.func @transform_3(%arg0: i32, %arg1: i32, %arg2: i32, %arg3: memref<1xi32, #tpu.memory_space<smem>>, %arg4: memref<1xi32, #tpu.memory_space<smem>>) -> (i32, i32, i32, i32) {
    %0 = arith.index_cast %arg2 : i32 to index
    %1 = memref.load %arg3[%0] : memref<1xi32, #tpu.memory_space<smem>>
    %c0_i32 = arith.constant 0 : i32
    %c0_i32_0 = arith.constant 0 : i32
    return %arg0, %arg1, %1, %c0_i32 : i32, i32, i32, i32
  }
}

</mosaic_0001>

<bundles_post_ra>
// kernel: causal_attention.4
= control target key start
LH: loop header
LB: loop body
LE: loop exit
PB: predicated region body
PF: predicated region fallthrough
CT: control target
= control target key end

     0   :  { %s992_s22 = smov 0   ;;  %s994_s23 = smov 0   ;;  %s1093_s0 = inlined_call_operand.<no memory space> [shape: s32[1], index: 0, kind: input, shape index: {}, may-alias: {0,1}]   ;;  %s1094_s1 = inlined_call_operand.<no memory space> [shape: s32[1], index: 1, kind: input, shape index: {}, may-alias: {0,1}]   ;;  %s1095_s2 = inlined_call_operand.vmem [shape: bf16[2,4,8,8], index: 2, kind: input, shape index: {}]   ;;  %s1096_s3 = inlined_call_operand.vmem [shape: bf16[2,4,8,8], index: 3, kind: input, shape index: {}]   ;;  %s1097_s4 = inlined_call_operand.vmem [shape: bf16[2,4,8,8], index: 4, kind: input, shape index: {}]   ;;  %s1098_s5 = inlined_call_operand.vmem [shape: bf16[2,4,8,8], index: 5, kind: output, shape index: {}]  }
   0x1   :  { %10 = sst [smem:[#allocation6]] %s1093_s0  ;;  %s996_s24 = smov 0  }
   0x2   :  { %11 = sst [smem:[#allocation7]] %s1094_s1  ;;  %s998_s25 = smov 0  }
   0x3   :  { %s1000_s26 = smov 0  }
   0x4 LB: > { %s32_s0 = sadd.s32 1, %s938_s24  ;;  %s36_s1 = sadd.s32 1, %s942_s25  ;;  %s946_s26 = sphi %s1000_s26, %s17_s26   ;;  %s942_s25 = sphi %s998_s25, %s1102_s25   ;;  %s938_s24 = sphi %s996_s24, %s1101_s24   ;;  %s934_s23 = sphi %s994_s23, %s1100_s23   ;;  %s930_s22 = sphi %s992_s22, %s1099_s22  }
   0x5   : > { %p34_p0 = scmp.ge.s32.totalorder %s32_s0, 4  ;;  %p796_p1 = scmp.ge.s32.totalorder %s946_s26, 1 }
   0x6   : > { %p228_p2 = scmp.lt.s32.totalorder %s946_s26, 9 }
   0x7   : > { %s1104_s0 = smov (%p34_p0, %s32_s0), 0  ;;  %s1106_s1 = smov (!%p34_p0, %s36_s1), %s942_s25 }
   0x8   : > { %p229_p3 = pnand %p796_p1, %p228_p2  ;;  %p38_p4 = scmp.ge.s32.totalorder %s1106_s1, 2 }
   0x9   : > { %s1022_s27 = sld [smem:[#allocation6]] (!%p229_p3)  ;;  %p291_p5 = scmp.lt.s32.totalorder (!%p229_p3), %s934_s23, 1 }
   0xa   : > { %s1108_s1 = smov (%p38_p4, %s1106_s1), 0  ;;  %232 = sbr.rel (%p229_p3) target bundleno = 1568 (0x620), region = 32 }
   0xb   : > { %p293_p6 = scmp.lt.s32.totalorder (!%p229_p3), %s930_s22, 3  ;;  %s1024_s28 = sld [smem:[#allocation7]] (!%p229_p3) }
   0xf   : > { %p295_p7 = scmp.lt.s32.totalorder (!%p229_p3), %s1022_s27, 0 }
  0x11   : > { %s1110_s23 = smov (!%p291_p5, %s934_s23), 1  ;;  %s1112_s22 = smov (!%p293_p6, %s930_s22), 3 }
  0x12   : > { %s797_s29 = sshll.u32 %s1110_s23, 2  ;;  %p308_p8 = scmp.lt.s32.totalorder %s1024_s28, 0 }
  0x13   : > { %s296_s30 = scalar_select %p295_p7, %s1022_s27, 0 }
  0x14   : > { %s309_s6 = scalar_select %p308_p8, %s1024_s28, 0 }
  0x15   : > { %s297_s7 = sadd.s32 %s296_s30, %s1112_s22  ;;  %p805_p9 = scmp.ne.s32.totalorder %s1024_s28, 0 }
  0x16   : > { %s299_s8 = sadd.s32 %s797_s29, %s297_s7  ;;  %s310_s9 = sadd.s32 %s309_s6, %s1112_s22  ;;  %vm349_vm0 = vcmask (!%p805_p9), 7168   ;;  %vm352_vm1 = vcmask (!%p805_p9), 64512   ;;  %v948_v0 = vmov (!%p805_p9), -1e+30   ;;  %v949_v1 = vmov (!%p805_p9), 0.0  }
  0x17   : > { %s798_s10 = sshll.u32 %s299_s8, 2  ;;  %s312_s11 = sadd.s32 %s797_s29, %s310_s9  ;;  %350 = vst.msk [vmem:[#allocation2] sm:$0xff] (!%p805_p9), %vm349_vm0, %v948_v0  ;;  %351 = vst.msk [vmem:[#allocation3] sm:$0xff] (!%p805_p9), %vm349_vm0, %v949_v1 }
  0x18   : > { %s1033_s14 = scalar_lea.vmem %s1095_s2, %s798_s10  ;;  %s800_s15 = sshll.u32 %s312_s11, 2  ;;  %353 = vst.msk [vmem:[#allocation4] sm:$0xff] (!%p805_p9), %vm352_vm1, %v949_v1 }
  0x19   : > { %s1038_s18 = scalar_lea.vmem %s1096_s3, %s800_s15  ;;  %s1043_s21 = scalar_lea.vmem %s1097_s4, %s800_s15 }
  0x1a   : > { %s1048_s29 = scalar_lea.vmem %s1098_s5, %s798_s10  ;;  %348 = sbr.rel (%p805_p9) target bundleno = 33 (0x21), region = 36 }
  0x21 PF: > { %p806_p10 = scmp.eq.s32.totalorder %s1024_s28, %s1022_s27 }
  0x22   : > { %v360_v2 = vld [vmem:[%s1038_s18] sm:$0xf] (!%p806_p10)  ;;  %vm361_vm2 = vcmask (!%p806_p10), 64512   ;;  %v950_v3 = vmov (!%p806_p10), 0.0   ;;  %vm951_vm3 = vmmov (!%p806_p10), 0   ;;  %v952_v11 = vmov (!%p806_p10), 0  }
  0x23   : > { %358 = sbr.rel (%p806_p10) target bundleno = 760 (0x2f8), region = 40  ;;  %822 = vmatprep.subr.bf16.mxu0 (!%p806_p10), %v950_v3  ;;  %v366_v4 = vsel (!%p806_p10), %vm361_vm2, %v360_v2, 0  ;;  %824 = vmatprep.mubr.msk.bf16.mxu0 (!%p806_p10), %vm951_vm3, %v950_v3  ;;  %v359_v5 = vld [vmem:[%s1033_s14] sm:$0xf] (!%p806_p10)  ;;  %vm430_vm4 = vcmask (!%p806_p10), 7168   ;;  %vm444_vm5 = vcmask (!%p806_p10), 1043456  }
  0x24   : > { %823 = vmatpush3.bf16.xpose.msra.mxu0 (!%p806_p10), %v366_v4  ;;  %828 = vmatprep.subr.bf16.mxu1 (!%p806_p10), %v950_v3  ;;  %v408_v12 = vld [vmem:[#allocation2] sm:$0xff] (!%p806_p10)  ;;  %v424_v26 = vld [vmem:[#allocation3] sm:$0xff] (!%p806_p10)  ;;  %v432_v30 = vld [vmem:[#allocation4] sm:$0xff] (!%p806_p10) }
  0x25   : > { %830 = vmatprep.mubr.msk.bf16.mxu1 (!%p806_p10), %vm951_vm3, %v950_v3  ;;  %894 = vset.pattern.permute.xlu0 (!%p806_p10), %v952_v11  ;;  %v440_v16 = vld [vmem:[%s1043_s21] sm:$0xf] (!%p806_p10) }
  0x26   : > { %895 = vset.pattern.permute.xlu1 (!%p806_p10), %v952_v11  ;;  %v446_v17 = vsel (!%p806_p10), %vm444_vm5, %v440_v16, 0 }
  0x27   : > { %829 = vmatpush3.bf16.msra.mxu1 (!%p806_p10), %v446_v17 }
  0x2b   : > { %825 = vmatmul.mubr.msk.bf16.vlgmr.msra.gmra.mrb[0].mxu0 %vm361_vm2, %v359_v5 }
  0xfe   : > { %v402_v6 = vpop.f32.mrb[0].mxu0 }
  0xff   : > { %v826_v7 = vpop.f32.mrb[1].mxu0  ;;  %v409_v8 = vsel %vm361_vm2, %v402_v6, -inf }
 0x100   : > { %410 = vmax.xlane.f32.xlu0 %v409_v8  ;;  %v405_v9 = vpop.f32.mrb[2].mxu0 }
 0x101   : > { %v827_v10 = vpop.f32.mrb[3].mxu0 }
 0x18d   : > { %v411_v13 = vpop.xlane.xlu0 %410 }
 0x18e   : > { %v412_v14 = vmax.f32 %v408_v12, %v411_v13 }
 0x190   : > { %v413_v15 = vsub.f32 %v408_v12, %v412_v14  ;;  %490 = vst.msk [vmem:[#allocation2] sm:$0xff] %vm430_vm4, %v412_v14  ;;  %418 = vperm.xlu0 %894, %v412_v14  }
 0x192   : > { %v414_v24 = vmul.f32 1.442695, %v413_v15 }
 0x20f   : > { %v419_v18 = vpop.permute.xlu0 %418 }
 0x210   : > { %v421_v19 = vsub.f32 %v402_v6, %v419_v18 }
 0x212   : > { %v422_v20 = vmul.f32 1.442695, %v421_v19 }
 0x214   : > { %896 = vpow2.f32 %v422_v20 }
 0x215   : > { %898 = vpow2.f32 %v414_v24 }
 0x21e   : > { %v897_v21 = vpop.eup %896 }
 0x21f   : > { %v426_v22 = vsel %vm361_vm2, %v897_v21, 0.0  ;;  %v439_v23 = vpack.c.bf16 %v897_v21, %v897_v21  ;;  %v899_v25 = vpop.eup %898 }
 0x220   : > { %427 = vadd.xlane.f32.xlu1 %v426_v22  ;;  %v425_v27 = vmul.f32 %v899_v25, %v424_v26 }
 0x221   : > { %831 = vmatmul.mubr.msk.bf16.vlgmr.msra.gmra.mrb[0].mxu1 %vm361_vm2, %v439_v23 }
 0x231   : > { %435 = vperm.xlu1 %895, %v899_v25  }
 0x2ad   : > { %v428_v28 = vpop.xlane.xlu1 %427 }
 0x2ae   : > { %v429_v29 = vadd.f32 %v428_v28, %v425_v27 }
 0x2b0   : > { %431 = vst.msk [vmem:[#allocation3] sm:$0xff] %vm430_vm4, %v429_v29 }
 0x2b1   : > { %v436_v31 = vpop.permute.xlu1 %435 }
 0x2b2   : > { %v438_v32 = vmul.f32 %v436_v31, %v432_v30 }
 0x2f4   : > { %v482_v33 = vpop.f32.mrb[0].mxu1 }
 0x2f5   : > { %v488_v34 = vadd.f32 %v482_v33, %v438_v32  ;;  %v832_v35 = vpop.f32.mrb[1].mxu1 }
 0x2f6   : > { %v485_v36 = vpop.f32.mrb[2].mxu1 }
 0x2f7   : > { %489 = vst.msk [vmem:[#allocation4] sm:$0xff] %vm361_vm2, %v488_v34  ;;  %v833_v37 = vpop.f32.mrb[3].mxu1 }
 0x2f8 PF: > { %p809_p11 = scmp.ne.s32.totalorder %s1024_s28, %s1022_s27 }
 0x2f9   : > { %v495_v38 = vld [vmem:[%s1038_s18] sm:$0xf] (!%p809_p11)  ;;  %vm496_vm6 = vcmask (!%p809_p11), 64512   ;;  %v953_v39 = vmov (!%p809_p11), 0.0   ;;  %vm954_vm7 = vmmov (!%p809_p11), 0   ;;  %v543_v42 = vlaneseq (!%p809_p11)  ;;  %v565_v2 = vld [vmem:[#allocation3] sm:$0xff] (!%p809_p11) }
 0x2fa   : > { %493 = sbr.rel (%p809_p11) target bundleno = 1568 (0x620), region = 44  ;;  %834 = vmatprep.subr.bf16.mxu0 (!%p809_p11), %v953_v39  ;;  %v501_v40 = vsel (!%p809_p11), %vm496_vm6, %v495_v38, 0  ;;  %836 = vmatprep.mubr.msk.bf16.mxu0 (!%p809_p11), %vm954_vm7, %v953_v39  ;;  %v494_v41 = vld [vmem:[%s1033_s14] sm:$0xf] (!%p809_p11)  ;;  %v955_v51 = vmov (!%p809_p11), 0   ;;  %vm571_vm9 = vcmask (!%p809_p11), 7168  }
 0x2fb   : > { %835 = vmatpush3.bf16.xpose.msra.mxu0 (!%p809_p11), %v501_v40  ;;  %840 = vmatprep.subr.bf16.mxu1 (!%p809_p11), %v953_v39  ;;  %v544_v43 = vshrl.u32 (!%p809_p11), %v543_v42, 7  ;;  %v546_v44 = vand.u32 (!%p809_p11), 127, %v543_v42  ;;  %v549_v52 = vld [vmem:[#allocation2] sm:$0xff] (!%p809_p11)  ;;  %vm585_vm10 = vcmask (!%p809_p11), 1043456   ;;  %vm642_vm11 = vcmask (!%p809_p11), 60416  }
 0x2fc   : > { %842 = vmatprep.mubr.msk.bf16.mxu1 (!%p809_p11), %vm954_vm7, %v953_v39  ;;  %900 = vset.pattern.permute.xlu0 (!%p809_p11), %v955_v51  ;;  %v581_v56 = vld [vmem:[%s1043_s21] sm:$0xf] (!%p809_p11) }
 0x2fd   : > { %vm547_vm8 = vcmp.le.s32.totalorder (!%p809_p11), %v546_v44, %v544_v43  ;;  %901 = vset.pattern.permute.xlu1 (!%p809_p11), %v955_v51  ;;  %v587_v57 = vsel (!%p809_p11), %vm585_vm10, %v581_v56, 0 }
 0x2fe   : > { %841 = vmatpush3.bf16.msra.mxu1 (!%p809_p11), %v587_v57  ;;  %v573_v8 = vld [vmem:[#allocation4] sm:$0xff] (!%p809_p11) }
 0x302   : > { %837 = vmatmul.mubr.msk.bf16.vlgmr.msra.gmra.mrb[0].mxu0 %vm496_vm6, %v494_v41 }
 0x3d5   : > { %v537_v45 = vpop.f32.mrb[0].mxu0 }
 0x3d6   : > { %v548_v46 = vsel %vm547_vm8, %v537_v45, -1e+30  ;;  %v838_v47 = vpop.f32.mrb[1].mxu0 }
 0x3d7   : > { %v540_v48 = vpop.f32.mrb[2].mxu0  ;;  %v550_v49 = vsel %vm496_vm6, %v548_v46, -inf }
 0x3d8   : > { %551 = vmax.xlane.f32.xlu0 %v550_v49  ;;  %v839_v50 = vpop.f32.mrb[3].mxu0 }
 0x465   : > { %v552_v53 = vpop.xlane.xlu0 %551 }
 0x466   : > { %v553_v54 = vmax.f32 %v549_v52, %v552_v53 }
 0x468   : > { %v554_v55 = vsub.f32 %v549_v52, %v553_v54  ;;  %631 = vst.msk [vmem:[#allocation2] sm:$0xff] %vm571_vm9, %v553_v54  ;;  %559 = vperm.xlu0 %900, %v553_v54  }
 0x46a   : > { %v555_v0 = vmul.f32 1.442695, %v554_v55 }
 0x4e7   : > { %v560_v58 = vpop.permute.xlu0 %559 }
 0x4e8   : > { %v562_v59 = vsub.f32 %v548_v46, %v560_v58 }
 0x4ea   : > { %v563_v60 = vmul.f32 1.442695, %v562_v59 }
 0x4ec   : > { %902 = vpow2.f32 %v563_v60 }
 0x4ed   : > { %904 = vpow2.f32 %v555_v0 }
 0x4f6   : > { %v903_v61 = vpop.eup %902 }
 0x4f7   : > { %v567_v62 = vsel %vm496_vm6, %v903_v61, 0.0  ;;  %v580_v63 = vpack.c.bf16 %v903_v61, %v903_v61  ;;  %v905_v1 = vpop.eup %904 }
 0x4f8   : > { %568 = vadd.xlane.f32.xlu1 %v567_v62  ;;  %v566_v3 = vmul.f32 %v905_v1, %v565_v2 }
 0x4f9   : > { %843 = vmatmul.mubr.msk.bf16.vlgmr.msra.gmra.mrb[0].mxu1 %vm496_vm6, %v580_v63 }
 0x509   : > { %576 = vperm.xlu1 %901, %v905_v1  }
 0x585   : > { %v569_v4 = vpop.xlane.xlu1 %568 }
 0x586   : > { %v570_v5 = vadd.f32 %v569_v4, %v566_v3 }
 0x588   : > { %572 = vst.msk [vmem:[#allocation3] sm:$0xff] %vm571_vm9, %v570_v5 }
 0x589   : > { %v577_v9 = vpop.permute.xlu1 %576 }
 0x58a   : > { %v579_v10 = vmul.f32 %v577_v9, %v573_v8 }
 0x58f   : > { %v633_v6 = vld [vmem:[#allocation3] sm:$0xff] }
 0x590   : > { %906 = vrcp.f32 %v633_v6 }
 0x59a   : > { %v907_v7 = vpop.eup %906 }
 0x59b   : > { %637 = vperm.xlu1 %901, %v907_v7  }
 0x5cc   : > { %v623_v11 = vpop.f32.mrb[0].mxu1 }
 0x5cd   : > { %v629_v12 = vadd.f32 %v623_v11, %v579_v10  ;;  %v844_v13 = vpop.f32.mrb[1].mxu1 }
 0x5ce   : > { %v626_v14 = vpop.f32.mrb[2].mxu1 }
 0x5cf   : > { %630 = vst.msk [vmem:[#allocation4] sm:$0xff] %vm496_vm6, %v629_v12  ;;  %v845_v15 = vpop.f32.mrb[3].mxu1 }
 0x5d6   : > { %v632_v16 = vld [vmem:[#allocation4] sm:$0xff] }
 0x61a   : > { %v638_v17 = vpop.permute.xlu1 %637 }
 0x61b   : > { %v640_v18 = vmul.f32 %v638_v17, %v632_v16 }
 0x61d   : > { %v641_v19 = vpack.c.bf16 %v640_v18, %v640_v18 }
 0x61f   : > { %643 = vst.msk [vmem:[%s1048_s29] sm:$0xf] %vm642_vm11, %v641_v19 }
 0x620 PF: > { %s17_s26 = sadd.s32 1, %s946_s26   ;;  %s1099_s22 = smov %s938_s24 }
 0x621   : > { %p14_p12 = scmp.ge.s32.totalorder %s17_s26, 10   ;;  %s1100_s23 = smov %s942_s25 }
 0x622   : > { %s1101_s24 = smov %s1104_s0  ;;  %s1102_s25 = smov %s1108_s1 }
 0x623   :  { %16 = sbr.rel (!%p14_p12) target bundleno = 4 (0x4), region = 80 }

// kernel: causal_attention.5
= control target key start
LH: loop header
LB: loop body
LE: loop exit
PB: predicated region body
PF: predicated region fallthrough
CT: control target
= control target key end

     0   :  { %8 = vsyncpa [#allocation3], 0  ;;  %s841_s0 = inlined_call_operand.vmem [shape: bf16[2,4,8,8], index: 0, kind: input, shape index: {}]   ;;  %s842_s1 = inlined_call_operand.vmem [shape: bf16[32,32], index: 1, kind: input, shape index: {}]   ;;  %s843_s2 = inlined_call_operand.vmem [shape: f32[1,32], index: 2, kind: input, shape index: {}]   ;;  %s844_s3 = inlined_call_operand.hbm [shape: f32[2,8,32], index: 3, kind: output, shape index: {}]  }
   0x1   :  { %10 = vsyncpa [#allocation3 + $0x1], 0  ;;  %s706_s12 = smov 0   ;;  %s708_s13 = smov 0  }
   0x2   :  { %s710_s14 = smov 0   ;;  %s712_s15 = smov 0  }
   0x3   :  { %s714_s16 = smov 0   ;;  %s716_s17 = smov 0  }
   0x4 LB: > { %s493_s18 = sadd.s32 4294967295, %s681_s17   ;;  %s494_s19 = sadd.s32 4294967294, %s681_s17   ;;  %s681_s17 = sphi %s716_s17, %s16_s17   ;;  %s677_s16 = sphi %s714_s16, %s851_s16   ;;  %s673_s15 = sphi %s712_s15, %s850_s15   ;;  %s669_s14 = sphi %s710_s14, %s849_s14   ;;  %s665_s13 = sphi %s708_s13, %s848_s13   ;;  %s661_s12 = sphi %s706_s12, %s847_s12  }
   0x5   : > { %s28_s20 = sadd.s32 1, %s677_s16  ;;  %s107_s21 = sadd.s32 1, %s669_s14 }
   0x6   : > { %p30_p0 = scmp.ge.s32.totalorder %s28_s20, 2  ;;  %p117_p1 = scmp.ne.s32.totalorder %s669_s14, %s665_s13 }
   0x7   : > { %p118_p2 = scmp.eq.s32.totalorder %s493_s18, 1  ;;  %p123_p3 = scmp.ne.s32.totalorder %s665_s13, %s661_s12 }
   0x8   : > { %s853_s20 = smov (%p30_p0, %s28_s20), 0  ;;  %p124_p5 = scmp.eq.s32.totalorder %s494_s19, 1 }
   0x9   : > { %p746_p4 = por %p118_p2, %p117_p1  ;;  %s102_s23 = ssub.s32 %s677_s16, %s853_s20 }
   0xa   : > { %p497_p6 = scmp.ge.s32.totalorder %s681_s17, 1  ;;  %p105_p7 = scmp.eq.s32.totalorder %s102_s23, 0 }
   0xb   : > { %p753_p8 = por %p124_p5, %p123_p3  ;;  %p159_p9 = scmp.lt.s32.totalorder %s681_s17, 3 }
   0xc   : > { %s759_s25 = scalar_select %p105_p7, %s669_s14, %s107_s21  }
   0xd   : > { %p160_p10 = pnand %p497_p6, %p159_p9 }
   0xe   : > { %v199_v0 = vld [vmem:[%s842_s1 + $0x4] sm:$0xf] (!%p160_p10)  ;;  %vm204_vm0 = vcmask (!%p160_p10), 1043456   ;;  %v196_v1 = vld [vmem:[%s842_s1] sm:$0xf] (!%p160_p10)  ;;  %v683_v2 = vmov (!%p160_p10), 0.0  }
   0xf   : > { %163 = sbr.rel (%p160_p10) target bundleno = 267 (0x10b), region = 32  ;;  %522 = vmatprep.subr.bf16.mxu0 (!%p160_p10), %v683_v2  ;;  %v206_v3 = vsel (!%p160_p10), %vm204_vm0, %v199_v0, 0  ;;  %528 = vmatprep.subr.bf16.mxu1 (!%p160_p10), %v683_v2  ;;  %v252_v4 = vsel (!%p160_p10), %vm204_vm0, %v196_v1, 0  ;;  %p186_p11 = scmp.lt.s32.totalorder (!%p160_p10), %s673_s15, 1  ;;  %vm684_vm1 = vmmov (!%p160_p10), 0   ;;  %vm200_vm2 = vcmask (!%p160_p10), 64512  }
  0x10   : > { %523 = vmatpush3.bf16.msra.mxu0 (!%p160_p10), %v206_v3  ;;  %529 = vmatpush3.bf16.msra.mxu1 (!%p160_p10), %v252_v4  ;;  %v296_v5 = vld [vmem:[%s842_s1 + $0x8] sm:$0xf] (!%p160_p10)  ;;  %v346_v6 = vld [vmem:[%s842_s1 + $0xc] sm:$0xf] (!%p160_p10)  ;;  %s183_s18 = sand.u32 (!%p160_p10), 1, %s665_s13   ;;  %s510_s26 = sshll.u32 (!%p160_p10), %s673_s15, 7 }
  0x11   : > { %524 = vmatprep.mubr.msk.bf16.mxu0 (!%p160_p10), %vm684_vm1, %v683_v2  ;;  %530 = vmatprep.mubr.msk.bf16.mxu1 (!%p160_p10), %vm684_vm1, %v683_v2  ;;  %v301_v7 = vsel (!%p160_p10), %vm204_vm0, %v296_v5, 0  ;;  %v351_v8 = vsel (!%p160_p10), %vm204_vm0, %v346_v6, 0  ;;  %s498_s19 = sshll.u32 (!%p160_p10), %s183_s18, 3  ;;  %v508_v27 = vld [vmem:[%s843_s2] ss:$0 sm:$0xff] (!%p160_p10)  ;;  %vm402_vm3 = vcmask (!%p160_p10), 261120   ;;  %s794_s4 = scalar_lea.hbm (!%p160_p10), %s844_s3, %s510_s26 }
  0x12   : > { %534 = vmatprep.subr.bf16.mxu0 (!%p160_p10), %v683_v2  ;;  %540 = vmatprep.subr.bf16.mxu1 (!%p160_p10), %v683_v2  ;;  %s185_s27 = scalar_lea.vmem (!%p160_p10), [#allocation2], %s498_s19  ;;  %s405_s5 = scalar_lea.sflag (!%p160_p10), [#allocation3], %s183_s18 }
  0x13   : > { %s419_s28 = sshll.u32 (!%p160_p10), %s185_s27, 4  ;;  %s685_s6 = smov (!%p160_p10), [#allocation2]   ;;  %s796_s28 = int_to_ptr.vmem [resolvable:$true] %s419_s28 }
  0x14   : > { %s607_s7 = sshll.u32 (!%p160_p10), %s685_s6, 4  ;;  %s608_s7 = int_to_ptr.vmem [resolvable:$false] %s607_s7 }
  0x15   : > { %p610_p1 = scmp.lt.s32.totalorder (!%p160_p10), %s796_s28, %s608_s7 }
  0x16   : > { %s187_s30 = scalar_select %p186_p11, %s673_s15, 1 }
  0x17   : > { %s603_s15 = scalar_lea.vmem %s796_s28, 128 }
  0x18   : > { %s513_s8 = sshll.u32 %s187_s30, 4  ;;  %p604_p12 = scmp.ne.s32.totalorder %s796_s28, %s603_s15 }
  0x19   : > { %s193_s11 = scalar_lea.vmem %s841_s0, %s513_s8  ;;  %s609_s8 = scalar_lea.vmem %s608_s7, 256 }
  0x1a   : > { %v501_v9 = vld [vmem:[%s193_s11 + $0x4] sm:$0xf]  ;;  %v195_v10 = vld [vmem:[%s193_s11] sm:$0xf]  ;;  %v504_v11 = vld [vmem:[%s193_s11 + $0x8] sm:$0xf]  ;;  %p605_p13 = pnand %p604_p12, %p746_p4  ;;  %p611_p2 = scmp.lt.s32.totalorder %s609_s8, %s603_s15 }
  0x1b   : > { %525 = vmatmul.mubr.msk.bf16.vlgmr.msra.gmra.mrb[0].mxu0 %vm200_vm2, %v501_v9  ;;  %531 = vmatmul.mubr.msk.bf16.vlgmr.msra.gmra.mrb[0].mxu1 %vm200_vm2, %v195_v10  ;;  %v506_v12 = vld [vmem:[%s193_s11 + $0xc] sm:$0xf] }
  0x1c   : > { %535 = vmatpush3.bf16.msra.mxu0 %v301_v7  ;;  %541 = vmatpush3.bf16.msra.mxu1 %v351_v8  ;;  %p606_p0 = pneg %p605_p13  ;;  %p612_p3 = por %p611_p2, %p610_p1 }
  0x1d   : > { %536 = vmatprep.mubr.msk.bf16.mxu0 %vm684_vm1, %v683_v2  ;;  %542 = vmatprep.mubr.msk.bf16.mxu1 %vm684_vm1, %v683_v2 }
  0x1e   : > { %p613_p5 = pnand %p612_p3, %p606_p0 }
  0x23   : > { %537 = vmatmul.mubr.msk.bf16.vlgmr.msra.gmra.mrb[4].mxu0 %vm200_vm2, %v504_v11  ;;  %543 = vmatmul.mubr.msk.bf16.vlgmr.msra.gmra.mrb[4].mxu1 %vm200_vm2, %v506_v12 }
  0xee   : > { %v242_v13 = vpop.f32.mrb[0].mxu0  ;;  %v288_v14 = vpop.f32.mrb[0].mxu1 }
  0xef   : > { %v289_v15 = vadd.f32 %v288_v14, %v242_v13  ;;  %v526_v16 = vpop.f32.mrb[1].mxu0  ;;  %v532_v17 = vpop.f32.mrb[1].mxu1 }
  0xf0   : > { %v245_v18 = vpop.f32.mrb[2].mxu0  ;;  %v291_v19 = vpop.f32.mrb[2].mxu1 }
  0xf1   : > { %v527_v20 = vpop.f32.mrb[3].mxu0  ;;  %v533_v21 = vpop.f32.mrb[3].mxu1 }
  0xf6   : > { %v337_v22 = vpop.f32.mrb[4].mxu0  ;;  %v387_v23 = vpop.f32.mrb[4].mxu1 }
  0xf7   : > { %v343_v24 = vadd.f32 %v337_v22, %v289_v15  ;;  %v538_v25 = vpop.f32.mrb[5].mxu0  ;;  %v544_v26 = vpop.f32.mrb[5].mxu1 }
  0xf8   : > { %v340_v28 = vpop.f32.mrb[6].mxu0  ;;  %v390_v29 = vpop.f32.mrb[6].mxu1 }
  0xf9   : > { %v393_v30 = vadd.f32 %v387_v23, %v343_v24  ;;  %v539_v31 = vpop.f32.mrb[7].mxu0  ;;  %v545_v32 = vpop.f32.mrb[7].mxu1 }
  0xfb   : > { %v401_v33 = vadd.f32 %v508_v27, %v393_v30 }
  0xfd   : > { %403 = vst.msk [vmem:[%s185_s27] sm:$0xff] %vm402_vm3, %v401_v33 }
  0xfe   : > { %616 = shalt.err (!%p613_p5)
}
  0xff   : > { %s617_s9 = scalar_lea.hbm %s794_s4, 128  ;;  %s621_s18 = scalar_lea.hbm %s844_s3, 256 }
 0x100   : > { %p618_p6 = scmp.ne.s32.totalorder %s794_s4, %s617_s9  ;;  %p622_p10 = scmp.lt.u32.totalorder %s794_s4, %s844_s3 }
 0x101   : > { %p623_p11 = scmp.lt.u32.totalorder %s621_s18, %s617_s9  ;;  %p625_p13 = scmp.lt.u32.totalorder %s617_s9, %s794_s4 }
 0x102   : > { %p619_p7 = pnand %p618_p6, %p746_p4 }
 0x103   : > { %p624_p12 = por %p623_p11, %p622_p10 }
 0x104   : > { %p620_p9 = pneg %p619_p7 }
 0x105   : > { %p626_p0 = por %p625_p13, %p624_p12 }
 0x107   : > { %p627_p1 = pnand %p626_p0, %p620_p9 }
 0x109   : > { %630 = shalt.err (!%p627_p1)
}
 0x10a   : > { %546 = dma.vmem_to_hbm [thread:$0]  (%p746_p4), %s796_s28, 128, %s794_s4, %s405_s5  }
 0x10b PF: > { %p552_p2 = scmp.ge.s32.totalorder %s681_s17, 2  ;;  %s431_s23 = sand.u32 1, %s661_s12  }
 0x10c   : > { %s432_s26 = scalar_lea.sflag [#allocation3], %s431_s23 }
 0x10d   : > { %p549_p3 = pnand %p552_p2, %p753_p8 }
 0x10f   : > { %656 = dma.done.wait (!%p549_p3), %s432_s26, 128  }
 0x110   : > { %658 = vsyncadd (!%p549_p3), %s432_s26, 4294967168  ;;  %s16_s17 = sadd.s32 1, %s681_s17   ;;  %s847_s12 = smov %s665_s13 }
 0x111   : > { %p13_p5 = scmp.ge.s32.totalorder %s16_s17, 4   ;;  %s848_s13 = smov %s669_s14 }
 0x112   : > { %s849_s14 = smov %s759_s25  ;;  %s850_s15 = smov %s677_s16 }
 0x113   : > { %s851_s16 = smov %s853_s20  ;;  %15 = sbr.rel (!%p13_p5) target bundleno = 4 (0x4), region = 70 }
 0x11a   :  { %437 = vsyncpa [#allocation3], 1 }
 0x11b   :  { %439 = vsyncpa [#allocation3 + $0x1], 1 }

// kernel: causal_attention.3
= control target key start
LH: loop header
LB: loop body
LE: loop exit
PB: predicated region body
PF: predicated region fallthrough
CT: control target
= control target key end

     0   :  { %s746_s18 = smov 0   ;;  %s748_s19 = smov 0   ;;  %s817_s0 = inlined_call_operand.vmem [shape: f32[2,8,32], index: 0, kind: input, shape index: {}]   ;;  %s818_s1 = inlined_call_operand.vmem [shape: bf16[32,96], index: 1, kind: input, shape index: {}]   ;;  %s819_s2 = inlined_call_operand.vmem [shape: f32[1,96], index: 2, kind: input, shape index: {}]   ;;  %s820_s3 = inlined_call_operand.vmem [shape: bf16[2,4,8,8], index: 3, kind: output, shape index: {0}]   ;;  %s821_s4 = inlined_call_operand.vmem [shape: bf16[2,4,8,8], index: 4, kind: output, shape index: {1}]   ;;  %s822_s5 = inlined_call_operand.vmem [shape: bf16[2,4,8,8], index: 5, kind: output, shape index: {2}]  }
   0x1   :  { %s750_s20 = smov 0  }
   0x2 LB: > { %s28_s21 = sadd.s32 1, %s697_s19  ;;  %p601_p0 = scmp.ge.s32.totalorder %s701_s20, 1  ;;  %s701_s20 = sphi %s750_s20, %s16_s20   ;;  %s697_s19 = sphi %s748_s19, %s824_s19   ;;  %s693_s18 = sphi %s746_s18, %s823_s18  }
   0x3   : > { %p30_p1 = scmp.ge.s32.totalorder %s28_s21, 2  ;;  %p214_p2 = scmp.lt.s32.totalorder %s701_s20, 3 }
   0x5   : > { %s826_s21 = smov (%p30_p1, %s28_s21), 0  ;;  %p215_p3 = pnand %p601_p0, %p214_p2 }
   0x6   : > { %v677_v0 = vld [vmem:[%s818_s1] sm:$0xff] (!%p215_p3)   ;;  %v703_v1 = vmov (!%p215_p3), 0.0   ;;  %v678_v2 = vld [vmem:[%s818_s1 + $0x8] sm:$0xff] (!%p215_p3)   ;;  %vm704_vm0 = vmmov (!%p215_p3), 0   ;;  %p263_p4 = scmp.lt.s32.totalorder (!%p215_p3), %s693_s18, 1  ;;  %vm320_vm1 = vcmask (!%p215_p3), 261120  }
   0x7   : > { %218 = sbr.rel (%p215_p3) target bundleno = 372 (0x174), region = 32  ;;  %632 = vmatprep.subr.bf16.mxu0 (!%p215_p3), %v703_v1  ;;  %636 = vmatprep.mubr.msk.bf16.mxu0 (!%p215_p3), %vm704_vm0, %v703_v1  ;;  %v609_v5 = vld [vmem:[%s819_s2] ss:$0 sm:$0xff] (!%p215_p3)  ;;  %vm365_vm2 = vcmask (!%p215_p3), 60416   ;;  %s705_s11 = smov (!%p215_p3), 120  }
   0x8   : > { %633 = vmatpush3.bf16.msra.mxu0 (!%p215_p3), %v677_v0  ;;  %s706_s12 = smov (!%p215_p3), 96   ;;  %s707_s13 = smov (!%p215_p3), 88  }
   0x9   : > { %634 = vmatprep.subr.bf16.mxu0 (!%p215_p3), %v703_v1  ;;  %s708_s14 = smov (!%p215_p3), 64   ;;  %s709_s15 = smov (!%p215_p3), 112  }
   0xa   : > { %s710_s16 = smov (!%p215_p3), 56   ;;  %s711_s17 = smov (!%p215_p3), 48  }
   0xb   : > { %s713_s22 = smov (!%p215_p3), 72   ;;  %s714_s23 = smov (!%p215_p3), 104  }
   0xc   : > { %635 = vmatpush3.bf16.msra.mxu0 (!%p215_p3), %v678_v2  ;;  %s715_s24 = smov (!%p215_p3), 40  }
   0xe   : > { %s828_s18 = smov (!%p263_p4, %s693_s18), 1 }
   0xf   : > { %s602_s26 = sshll.u32 %s828_s18, 3  ;;  %s776_s7 = sshll.u32 %s828_s18, 4 }
  0x10   : > { %s269_s29 = scalar_lea.vmem %s817_s0, %s602_s26  ;;  %s782_s10 = scalar_lea.vmem %s820_s3, %s776_s7 }
  0x11   : > { %v295_v3 = vld [vmem:[%s269_s29] sm:$0xff]  ;;  %s712_s18 = smov 80   ;;  %s285_s27 = scalar_lea.vmem %s821_s4, %s776_s7 }
  0x12   : > { %v296_v4 = vpack.c.bf16 %v295_v3, %v295_v3  ;;  %s293_s30 = scalar_lea.vmem %s822_s5, %s776_s7 }
  0x14   : > { %637 = vmatmul.mubr.msk.bf16.vlgmr.msra.gmra.mrb[0].mxu0 %vm320_vm1, %v296_v4 }
  0xe7   : > { %v358_v6 = vpop.f32.mrb[0].mxu0 }
  0xe8   : > { %v359_v7 = vadd.f32 %v609_v5, %v358_v6  ;;  %v638_v8 = vpop.f32.mrb[1].mxu0 }
  0xe9   : > { %v361_v9 = vpop.f32.mrb[2].mxu0 }
  0xea   : > { %v364_v10 = vpack.c.bf16 %v359_v7, %v359_v7  ;;  %v639_v11 = vpop.f32.mrb[3].mxu0 }
  0xec   : > { %378 = vrot.lane.b32.xlu1 %v364_v10, %s705_s11  ;;  %370 = vrot.lane.b32.xlu0 %v364_v10, %s706_s12  ;;  %366 = vst.msk [vmem:[%s782_s10] sm:$0xf] %vm365_vm2, %v364_v10 }
  0xf0   : > { %383 = vrot.lane.b32.xlu1 %v364_v10, %s707_s13  ;;  %374 = vrot.lane.b32.xlu0 %v364_v10, %s708_s14 }
  0xf4   : > { %393 = vrot.lane.b32.xlu1 %v364_v10, %s709_s15  ;;  %388 = vrot.lane.b32.xlu0 %v364_v10, %s710_s16 }
  0xf8   : > { %403 = vrot.lane.b32.xlu1 %v364_v10, %s711_s17  ;;  %398 = vrot.lane.b32.xlu0 %v364_v10, %s712_s18 }
  0xfc   : > { %413 = vrot.lane.b32.xlu1 %v364_v10, %s713_s22  ;;  %408 = vrot.lane.b32.xlu0 %v364_v10, %s714_s23 }
 0x100   : > { %418 = vrot.lane.b32.xlu0 %v364_v10, %s715_s24 }
 0x15e   : > { %v379_v12 = vpop.permute.xlu1 %378  ;;  %v371_v13 = vpop.permute.xlu0 %370 }
 0x15f   : > { %614 = vst.msk [vmem:[%s782_s10 + $0x4] sm:$0xf] %vm365_vm2, %v379_v12  ;;  %373 = vst.msk [vmem:[%s285_s27] sm:$0xf] %vm365_vm2, %v371_v13 }
 0x162   : > { %v384_v14 = vpop.permute.xlu1 %383  ;;  %v375_v15 = vpop.permute.xlu0 %374 }
 0x163   : > { %615 = vst.msk [vmem:[%s285_s27 + $0x4] sm:$0xf] %vm365_vm2, %v384_v14  ;;  %377 = vst.msk [vmem:[%s293_s30] sm:$0xf] %vm365_vm2, %v375_v15 }
 0x166   : > { %v394_v16 = vpop.permute.xlu1 %393  ;;  %v389_v17 = vpop.permute.xlu0 %388 }
 0x167   : > { %617 = vst.msk [vmem:[%s782_s10 + $0x8] sm:$0xf] %vm365_vm2, %v394_v16  ;;  %616 = vst.msk [vmem:[%s293_s30 + $0x4] sm:$0xf] %vm365_vm2, %v389_v17 }
 0x16a   : > { %v404_v18 = vpop.permute.xlu1 %403  ;;  %v399_v19 = vpop.permute.xlu0 %398 }
 0x16b   : > { %619 = vst.msk [vmem:[%s293_s30 + $0x8] sm:$0xf] %vm365_vm2, %v404_v18  ;;  %618 = vst.msk [vmem:[%s285_s27 + $0x8] sm:$0xf] %vm365_vm2, %v399_v19 }
 0x16e   : > { %v414_v20 = vpop.permute.xlu1 %413  ;;  %v409_v21 = vpop.permute.xlu0 %408 }
 0x16f   : > { %621 = vst.msk [vmem:[%s285_s27 + $0xc] sm:$0xf] %vm365_vm2, %v414_v20  ;;  %620 = vst.msk [vmem:[%s782_s10 + $0xc] sm:$0xf] %vm365_vm2, %v409_v21 }
 0x172   : > { %v419_v22 = vpop.permute.xlu0 %418 }
 0x173   : > { %622 = vst.msk [vmem:[%s293_s30 + $0xc] sm:$0xf] %vm365_vm2, %v419_v22 }
 0x174 PF: > { %s16_s20 = sadd.s32 1, %s701_s20   ;;  %s823_s18 = smov %s697_s19 }
 0x175   : > { %p13_p5 = scmp.ge.s32.totalorder %s16_s20, 4   ;;  %s824_s19 = smov %s826_s21 }
 0x177   :  { %15 = sbr.rel (!%p13_p5) target bundleno = 2 (0x2), region = 95 }

</bundles_post_ra>
